<compile_context>
chip_gen: v6e
topology: v6e:2x2x1
jax: 0.10.0
libtpu: 0.0.40
codegen_flags: <defaults>
</compile_context>

<pallas_src>
import functools
import math

import jax
import jax.numpy as jnp
from jax.experimental import pallas as pl
from jax.experimental.pallas import tpu as pltpu


# --------------------------------------------------------------------------
# helpers
# --------------------------------------------------------------------------
def _pick_tile(n, maximum):
    """Largest tile <= maximum that divides n (prefers multiples of 8)."""
    if n <= maximum:
        return n
    for t in range(maximum, 7, -1):
        if n % t == 0 and t % 8 == 0:
            return t
    return n


# --------------------------------------------------------------------------
# Pallas kernels
# --------------------------------------------------------------------------
def _linear_bn_kernel(x_ref, wt_ref, b_ref, sc_ref, sh_ref, o_ref, *, act):
    # y = act((x @ wt + b) * scale + shift)   (scale/shift fold an eval-mode BN)
    y = jnp.dot(x_ref[...].astype(jnp.bfloat16), wt_ref[...],
                preferred_element_type=jnp.float32)
    y = (y + b_ref[...]) * sc_ref[...] + sh_ref[...]
    if act == "relu":
        y = jnp.maximum(y, 0.0)
    o_ref[...] = y


def pallas_linear_bn(x, wt_bf16, b, scale, shift, act="relu"):
    """x:(M,K) f32, wt:(K,N) bf16 (pre-transposed). Returns (M,N) f32."""
    M, K = x.shape
    N = wt_bf16.shape[1]
    TM = _pick_tile(M, 512)
    fixed2 = lambda shape: pl.BlockSpec(shape, lambda i: (0, 0))
    return pl.pallas_call(
        functools.partial(_linear_bn_kernel, act=act),
        grid=(M // TM,),
        in_specs=[pl.BlockSpec((TM, K), lambda i: (i, 0)),
                  fixed2((K, N)), fixed2((1, N)), fixed2((1, N)), fixed2((1, N))],
        out_specs=pl.BlockSpec((TM, N), lambda i: (i, 0)),
        out_shape=jax.ShapeDtypeStruct((M, N), jnp.float32),
        compiler_params=pltpu.CompilerParams(dimension_semantics=("parallel",)),
    )(x.astype(jnp.float32), wt_bf16,
      b.reshape(1, N).astype(jnp.float32),
      scale.reshape(1, N).astype(jnp.float32),
      shift.reshape(1, N).astype(jnp.float32))


def _encoder_layer_kernel(x_ref, inw_ref, inb_ref, outw_ref, outb_ref,
                          l1w_ref, l1b_ref, l2w_ref, l2b_ref,
                          ln1g_ref, ln1b_ref, ln2g_ref, ln2b_ref,
                          o_ref, *, nhead, eps):
    # One full post-norm nn.TransformerEncoderLayer (eval mode) for one batch row.
    def layernorm(v, g, b):
        mu = jnp.mean(v, axis=-1, keepdims=True)
        var = jnp.mean((v - mu) * (v - mu), axis=-1, keepdims=True)
        return (v - mu) * jax.lax.rsqrt(var + eps) * g + b

    x = x_ref[0]                                          # (L, E) f32
    E = x.shape[1]
    hd = E // nhead
    scale = 1.0 / math.sqrt(hd)

    # fused QKV projection (bf16 MXU, f32 accumulation)
    qkv = jnp.dot(x.astype(jnp.bfloat16), inw_ref[...],
                  preferred_element_type=jnp.float32) + inb_ref[...]     # (L, 3E)
    out_w = outw_ref[...]                                 # (E, E) f32, pre-transposed

    # per-head attention; out-projection folded into a per-head slice of out_w
    # (avoids concatenating heads).  Head dims are tiny, keep those dots in f32.
    attn = jnp.zeros_like(x)
    for h in range(nhead):
        q = qkv[:, h * hd:(h + 1) * hd]
        k = qkv[:, E + h * hd:E + (h + 1) * hd]
        v = qkv[:, 2 * E + h * hd:2 * E + (h + 1) * hd]
        s = jax.lax.dot_general(q, k, (((1,), (1,)), ((), ())),
                                preferred_element_type=jnp.float32) * scale
        m = jnp.max(s, axis=-1, keepdims=True)
        p = jnp.exp(s - m)
        p = p * pl.reciprocal(jnp.sum(p, axis=-1, keepdims=True), approx=True)
        oh = jnp.dot(p, v, preferred_element_type=jnp.float32)           # (L, hd)
        attn = attn + jnp.dot(oh, out_w[h * hd:(h + 1) * hd, :],
                              preferred_element_type=jnp.float32)
    attn = attn + outb_ref[...]

    x1 = layernorm(x + attn, ln1g_ref[...], ln1b_ref[...])

    # FFN: the (L, 2048) intermediate stays in VMEM.
    f = jnp.dot(x1.astype(jnp.bfloat16), l1w_ref[...],
                preferred_element_type=jnp.float32) + l1b_ref[...]
    f = jnp.maximum(f, 0.0)
    f = jnp.dot(f.astype(jnp.bfloat16), l2w_ref[...],
                preferred_element_type=jnp.float32) + l2b_ref[...]

    o_ref[0] = layernorm(x1 + f, ln2g_ref[...], ln2b_ref[...])


def pallas_encoder_layer(x, lp, nhead, eps=1e-5):
    """x: (B, L, E) f32 tokens -> (B, L, E) f32."""
    B, L, E = x.shape
    F = lp["l1_wt"].shape[1]
    fixed = lambda shape: pl.BlockSpec(shape, lambda b: (0, 0))
    tok = pl.BlockSpec((1, L, E), lambda b: (b, 0, 0))
    return pl.pallas_call(
        functools.partial(_encoder_layer_kernel, nhead=nhead, eps=eps),
        grid=(B,),
        in_specs=[tok,
                  fixed((E, 3 * E)), fixed((1, 3 * E)),
                  fixed((E, E)), fixed((1, E)),
                  fixed((E, F)), fixed((1, F)),
                  fixed((F, E)), fixed((1, E)),
                  fixed((1, E)), fixed((1, E)), fixed((1, E)), fixed((1, E))],
        out_specs=tok,
        out_shape=jax.ShapeDtypeStruct((B, L, E), jnp.float32),
        compiler_params=pltpu.CompilerParams(dimension_semantics=("parallel",)),
    )(x, lp["in_wt"], lp["in_b"], lp["out_wt"], lp["out_b"],
      lp["l1_wt"], lp["l1_b"], lp["l2_wt"], lp["l2_b"],
      lp["ln1_g"], lp["ln1_b"], lp["ln2_g"], lp["ln2_b"])


def _contact_kernel(si_ref, sj_ref, wa_ref, wb_ref, wp_ref, o_ref, *, L, TI, TJ):
    # LocallyConnected2d(kernel=1) over infor = [seq[min(i,j)] | seq[max(i,j)] | pos_i | pos_j]
    # for one (batch, row-tile, col-tile) step.  Only a (C, TI, TJ) slab lives in VMEM.
    si = si_ref[0]                                        # (E, TI) rows (index i)
    sj = sj_ref[0]                                        # (E, TJ) cols (index j)
    wa = wa_ref[...]                                      # (E, TI, TJ) weights for seq[min]
    wb = wb_ref[...]                                      # (E, TI, TJ) weights for seq[max]
    E = si.shape[0]
    shape3 = (E, TI, TJ)

    ii = pl.program_id(1) * TI + jax.lax.broadcasted_iota(jnp.int32, (TI, TJ), 0)
    jj = pl.program_id(2) * TJ + jax.lax.broadcasted_iota(jnp.int32, (TI, TJ), 1)
    upper = jnp.broadcast_to((ii <= jj)[None, :, :], shape3)      # min(i,j) == i

    si_f = jnp.broadcast_to(si[:, :, None], shape3)
    sj_f = jnp.broadcast_to(sj[:, None, :], shape3)
    smin = jnp.where(upper, si_f, sj_f)                   # seq[min(i,j)]
    smax = jnp.where(upper, sj_f, si_f)                   # seq[max(i,j)]

    raw = jnp.sum(wa * smin + wb * smax, axis=0)          # (TI, TJ)

    inv_l = 1.0 / float(L)
    raw = raw + wp_ref[0] * ((ii + 1).astype(jnp.float32) * inv_l)   # pos_i channel
    raw = raw + wp_ref[1] * ((jj + 1).astype(jnp.float32) * inv_l)   # pos_j channel
    o_ref[0] = raw


def pallas_contact(seq_cm, wa, wb, wp, L):
    """seq_cm: (B, E, L) channel-major tokens; wa/wb: (E, L, L); wp: (2, L, L).
    Returns the un-symmetrized LocallyConnected2d output (B, L, L)."""
    B, E, _ = seq_cm.shape
    TI = _pick_tile(L, 128)
    TJ = _pick_tile(L, 128)
    return pl.pallas_call(
        functools.partial(_contact_kernel, L=L, TI=TI, TJ=TJ),
        grid=(B, L // TI, L // TJ),
        in_specs=[
            pl.BlockSpec((1, E, TI), lambda b, i, j: (b, 0, i)),
            pl.BlockSpec((1, E, TJ), lambda b, i, j: (b, 0, j)),
            pl.BlockSpec((E, TI, TJ), lambda b, i, j: (0, i, j)),
            pl.BlockSpec((E, TI, TJ), lambda b, i, j: (0, i, j)),
            pl.BlockSpec((2, TI, TJ), lambda b, i, j: (0, i, j)),
        ],
        out_specs=pl.BlockSpec((1, TI, TJ), lambda b, i, j: (b, i, j)),
        out_shape=jax.ShapeDtypeStruct((B, L, L), jnp.float32),
        compiler_params=pltpu.CompilerParams(
            dimension_semantics=("parallel", "parallel", "parallel")),
    )(seq_cm, seq_cm, wa, wb, wp)


# --------------------------------------------------------------------------
# Parameters (deterministic, synthetic; PyTorch layouts) + one-time preprocessing
# --------------------------------------------------------------------------
def init_params(key, d, L):
    E = d + 1
    keys = iter(jax.random.split(key, 64))
    nrm = lambda shape, s=0.1: s * jax.random.normal(next(keys), shape, jnp.float32)
    p = {}
    # conv1d1 (4->d, k=9, pad=8, dil=2) + bn1 ; conv1d2 (d->d) + bn2 (eval mode)
    p["c1_w"], p["c1_b"] = nrm((d, 4, 9)), nrm((d,))
    p["bn1_g"], p["bn1_b"] = 1.0 + nrm((d,)), nrm((d,))
    p["bn1_m"], p["bn1_v"] = nrm((d,)), 1.0 + jnp.abs(nrm((d,)))
    p["c2_w"], p["c2_b"] = nrm((d, d, 9)), nrm((d,))
    p["bn2_g"], p["bn2_b"] = 1.0 + nrm((d,)), nrm((d,))
    p["bn2_m"], p["bn2_v"] = nrm((d,)), 1.0 + jnp.abs(nrm((d,)))
    # TransformerEncoder: 3 x TransformerEncoderLayer(d_model=d+1, nhead=2, ffn=2048)
    layers = []
    for _ in range(3):
        layers.append(dict(
            in_w=nrm((3 * E, E)), in_b=nrm((3 * E,)),
            out_w=nrm((E, E)), out_b=nrm((E,)),
            lin1_w=nrm((2048, E)), lin1_b=nrm((2048,)),
            lin2_w=nrm((E, 2048)), lin2_b=nrm((E,)),
            ln1_g=jnp.ones((E,), jnp.float32), ln1_b=jnp.zeros((E,), jnp.float32),
            ln2_g=jnp.ones((E,), jnp.float32), ln2_b=jnp.zeros((E,), jnp.float32)))
    p["layers"] = layers
    # LocallyConnected2d(2d+4 -> 1, output_size=L, kernel_size=1, bias=False)
    p["lc_w"] = nrm((2 * E + 2, L, L))
    return p


def preprocess(params, d, L, eps=1e-5):
    """Pre-transpose / pre-fold all weights once (no per-call transposes)."""
    E = d + 1

    def conv_prep(w, b, g, beta, m, v):
        scale = g / jnp.sqrt(v + eps)
        return dict(wt=w.reshape(w.shape[0], -1).T.astype(jnp.bfloat16),
                    b=b, scale=scale, shift=beta - m * scale)

    prep = {}
    prep["c1"] = conv_prep(params["c1_w"], params["c1_b"], params["bn1_g"],
                           params["bn1_b"], params["bn1_m"], params["bn1_v"])
    prep["c2"] = conv_prep(params["c2_w"], params["c2_b"], params["bn2_g"],
                           params["bn2_b"], params["bn2_m"], params["bn2_v"])
    layers = []
    for lp in params["layers"]:
        layers.append(dict(
            in_wt=lp["in_w"].T.astype(jnp.bfloat16),
            in_b=lp["in_b"].reshape(1, -1),
            out_wt=lp["out_w"].T.astype(jnp.float32),
            out_b=lp["out_b"].reshape(1, -1),
            l1_wt=lp["lin1_w"].T.astype(jnp.bfloat16),
            l1_b=lp["lin1_b"].reshape(1, -1),
            l2_wt=lp["lin2_w"].T.astype(jnp.bfloat16),
            l2_b=lp["lin2_b"].reshape(1, -1),
            ln1_g=lp["ln1_g"].reshape(1, -1), ln1_b=lp["ln1_b"].reshape(1, -1),
            ln2_g=lp["ln2_g"].reshape(1, -1), ln2_b=lp["ln2_b"].reshape(1, -1)))
    prep["layers"] = layers
    lc = params["lc_w"]                        # (2E+2, L, L)
    prep["lc_wa"] = lc[:E]                     # applied to seq[min(i,j)]
    prep["lc_wb"] = lc[E:2 * E]                # applied to seq[max(i,j)]
    prep["lc_wp"] = lc[2 * E:]                 # applied to (pos_i, pos_j)
    return prep


# --------------------------------------------------------------------------
# Forward pass
# --------------------------------------------------------------------------
def _dilated_conv_bn_relu(x, cp):
    """Dilation-2, kernel-9, pad-8 conv1d + folded BN + ReLU, via im2col + Pallas matmul."""
    B, L, Cin = x.shape
    xp = jnp.pad(x, ((0, 0), (8, 8), (0, 0)))
    patches = jnp.stack([xp[:, 2 * k:2 * k + L, :] for k in range(9)], axis=-1)  # (B,L,Cin,9)
    patches = patches.reshape(B * L, Cin * 9)
    y = pallas_linear_bn(patches, cp["wt"], cp["b"], cp["scale"], cp["shift"], act="relu")
    return y.reshape(B, L, -1)


def forward(prep, prior, seq, state, d, L):
    del prior, state                                   # unused by the module's forward
    B = seq.shape[0]

    # conv1d1 + bn1 + relu  ->  conv1d2 + bn2 + relu       (B, L, d)
    h = _dilated_conv_bn_relu(seq.astype(jnp.float32), prep["c1"])
    h = _dilated_conv_bn_relu(h, prep["c2"])

    # concat fixed 1-D position embedding -> tokens (B, L, d+1)
    pos1d = (jnp.arange(1, L + 1, dtype=jnp.float32) / float(L))[None, :, None]
    xt = jnp.concatenate([h, jnp.broadcast_to(pos1d, (B, L, 1))], axis=-1)

    # 3 fused transformer encoder layers (nhead=2, ffn=2048, post-norm, eval mode)
    for lp in prep["layers"]:
        xt = pallas_encoder_layer(xt, lp, nhead=2)

    # matrix_rep + fixed 2-D position embedding + LocallyConnected2d(k=1), tiled
    seq_cm = jnp.transpose(xt, (0, 2, 1))              # (B, d+1, L) channel-major
    raw = pallas_contact(seq_cm, prep["lc_wa"], prep["lc_wb"], prep["lc_wp"], L)
    contact = 0.5 * (raw + jnp.swapaxes(raw, -1, -2))  # symmetrize
    return contact                                     # (B, L, L)


# --------------------------------------------------------------------------
if __name__ == "__main__":
    d, L, B = 15, 16, 2          # d_model = d+1 = 16 (must be divisible by nhead=2)
    key = jax.random.PRNGKey(0)
    kp, kprior, kseq, kst = jax.random.split(key, 4)
    params = init_params(kp, d, L)
    prep = preprocess(params, d, L)

    prior = jax.random.normal(kprior, (B, L, L, 1), jnp.float32)   # unused by forward
    seq = jax.random.normal(kseq, (B, L, 4), jnp.float32)
    state = jax.random.normal(kst, (B, L, L), jnp.float32)          # unused by forward

    fwd = jax.jit(functools.partial(forward, d=d, L=L))
    out = fwd(prep, prior, seq, state)
    out = jax.block_until_ready(out)

    assert out.shape == (B, L, L)
    assert bool(jnp.allclose(out, jnp.swapaxes(out, -1, -2), atol=1e-5))
    print("KERNEL_OK")
</pallas_src>

<mosaic_0001>
module attributes {stable_mosaic.version = 11 : i64} {
  func.func @_linear_bn_kernel(%arg0: i32, %arg1: memref<32x36xf32, #tpu.memory_space<vmem>>, %arg2: memref<36x15xbf16, #tpu.memory_space<vmem>>, %arg3: memref<1x15xf32, #tpu.memory_space<vmem>>, %arg4: memref<1x15xf32, #tpu.memory_space<vmem>>, %arg5: memref<1x15xf32, #tpu.memory_space<vmem>>, %arg6: memref<32x15xf32, #tpu.memory_space<vmem>>) attributes {dimension_semantics = [#tpu.dimension_semantics<parallel>], iteration_bounds = array<i64: 1>, scalar_prefetch = 0 : i64, scratch_operands = 0 : i64, tpu.core_type = #tpu.core_type<tc>, window_params = [{transform_indices = @transform_0, window_bounds = array<i64: 32, 36>}, {pipeline_mode = #tpu.pipeline_mode<synchronous>, transform_indices = @transform_1, window_bounds = array<i64: 36, 15>}, {pipeline_mode = #tpu.pipeline_mode<synchronous>, transform_indices = @transform_2, window_bounds = array<i64: 1, 15>}, {pipeline_mode = #tpu.pipeline_mode<synchronous>, transform_indices = @transform_3, window_bounds = array<i64: 1, 15>}, {pipeline_mode = #tpu.pipeline_mode<synchronous>, transform_indices = @transform_4, window_bounds = array<i64: 1, 15>}, {transform_indices = @transform_5, window_bounds = array<i64: 32, 15>}]} {
    %c0 = arith.constant 0 : index
    %c0_0 = arith.constant 0 : index
    %0 = vector.load %arg1[%c0, %c0_0] : memref<32x36xf32, #tpu.memory_space<vmem>>, vector<32x36xf32>
    %1 = arith.truncf %0 : vector<32x36xf32> to vector<32x36xbf16>
    %c0_1 = arith.constant 0 : index
    %c0_2 = arith.constant 0 : index
    %2 = vector.load %arg2[%c0_1, %c0_2] : memref<36x15xbf16, #tpu.memory_space<vmem>>, vector<36x15xbf16>
    %cst = arith.constant dense<0.000000e+00> : vector<32x15xf32>
    %3 = tpu.matmul %1, %2, %cst {dimension_numbers = #tpu.dot_dimension_numbers<[1], [0], [0], [1], [0, 0, 1, 1], [], []>} : vector<32x36xbf16>, vector<36x15xbf16>, vector<32x15xf32> -> vector<32x15xf32>
    %c0_3 = arith.constant 0 : index
    %c0_4 = arith.constant 0 : index
    %4 = vector.load %arg3[%c0_3, %c0_4] : memref<1x15xf32, #tpu.memory_space<vmem>>, vector<1x15xf32>
    %5 = vector.broadcast %4 : vector<1x15xf32> to vector<32x15xf32>
    %6 = arith.addf %3, %5 : vector<32x15xf32>
    %c0_5 = arith.constant 0 : index
    %c0_6 = arith.constant 0 : index
    %7 = vector.load %arg4[%c0_5, %c0_6] : memref<1x15xf32, #tpu.memory_space<vmem>>, vector<1x15xf32>
    %8 = vector.broadcast %7 : vector<1x15xf32> to vector<32x15xf32>
    %9 = arith.mulf %6, %8 : vector<32x15xf32>
    %c0_7 = arith.constant 0 : index
    %c0_8 = arith.constant 0 : index
    %10 = vector.load %arg5[%c0_7, %c0_8] : memref<1x15xf32, #tpu.memory_space<vmem>>, vector<1x15xf32>
    %11 = vector.broadcast %10 : vector<1x15xf32> to vector<32x15xf32>
    %12 = arith.addf %9, %11 : vector<32x15xf32>
    %cst_9 = arith.constant 0.000000e+00 : f32
    %13 = vector.broadcast %cst_9 : f32 to vector<32x15xf32>
    %14 = arith.maximumf %12, %13 : vector<32x15xf32>
    %c0_10 = arith.constant 0 : index
    %c0_11 = arith.constant 0 : index
    %15 = vector.load %arg6[%c0_10, %c0_11] : memref<32x15xf32, #tpu.memory_space<vmem>>, vector<32x15xf32>
    tpu.vector_store %arg6[%c0_10, %c0_11], %14 {strides = array<i32>} : memref<32x15xf32, #tpu.memory_space<vmem>>, vector<32x15xf32>,
    return
  }
  func.func @transform_0(%arg0: i32) -> (i32, i32) {
    %c0_i32 = arith.constant 0 : i32
    %c0_i32_0 = arith.constant 0 : i32
    return %arg0, %c0_i32 : i32, i32
  }
  func.func @transform_1(%arg0: i32) -> (i32, i32) {
    %c0_i32 = arith.constant 0 : i32
    %c0_i32_0 = arith.constant 0 : i32
    %c0_i32_1 = arith.constant 0 : i32
    return %c0_i32, %c0_i32_0 : i32, i32
  }
  func.func @transform_2(%arg0: i32) -> (i32, i32) {
    %c0_i32 = arith.constant 0 : i32
    %c0_i32_0 = arith.constant 0 : i32
    %c0_i32_1 = arith.constant 0 : i32
    return %c0_i32, %c0_i32_0 : i32, i32
  }
  func.func @transform_3(%arg0: i32) -> (i32, i32) {
    %c0_i32 = arith.constant 0 : i32
    %c0_i32_0 = arith.constant 0 : i32
    %c0_i32_1 = arith.constant 0 : i32
    return %c0_i32, %c0_i32_0 : i32, i32
  }
  func.func @transform_4(%arg0: i32) -> (i32, i32) {
    %c0_i32 = arith.constant 0 : i32
    %c0_i32_0 = arith.constant 0 : i32
    %c0_i32_1 = arith.constant 0 : i32
    return %c0_i32, %c0_i32_0 : i32, i32
  }
  func.func @transform_5(%arg0: i32) -> (i32, i32) {
    %c0_i32 = arith.constant 0 : i32
    %c0_i32_0 = arith.constant 0 : i32
    return %arg0, %c0_i32 : i32, i32
  }
}

module attributes {stable_mosaic.version = 11 : i64} {
  func.func @_linear_bn_kernel(%arg0: i32, %arg1: memref<32x135xf32, #tpu.memory_space<vmem>>, %arg2: memref<135x15xbf16, #tpu.memory_space<vmem>>, %arg3: memref<1x15xf32, #tpu.memory_space<vmem>>, %arg4: memref<1x15xf32, #tpu.memory_space<vmem>>, %arg5: memref<1x15xf32, #tpu.memory_space<vmem>>, %arg6: memref<32x15xf32, #tpu.memory_space<vmem>>) attributes {dimension_semantics = [#tpu.dimension_semantics<parallel>], iteration_bounds = array<i64: 1>, scalar_prefetch = 0 : i64, scratch_operands = 0 : i64, tpu.core_type = #tpu.core_type<tc>, window_params = [{transform_indices = @transform_0, window_bounds = array<i64: 32, 135>}, {pipeline_mode = #tpu.pipeline_mode<synchronous>, transform_indices = @transform_1, window_bounds = array<i64: 135, 15>}, {pipeline_mode = #tpu.pipeline_mode<synchronous>, transform_indices = @transform_2, window_bounds = array<i64: 1, 15>}, {pipeline_mode = #tpu.pipeline_mode<synchronous>, transform_indices = @transform_3, window_bounds = array<i64: 1, 15>}, {pipeline_mode = #tpu.pipeline_mode<synchronous>, transform_indices = @transform_4, window_bounds = array<i64: 1, 15>}, {transform_indices = @transform_5, window_bounds = array<i64: 32, 15>}]} {
    %c0 = arith.constant 0 : index
    %c0_0 = arith.constant 0 : index
    %0 = vector.load %arg1[%c0, %c0_0] : memref<32x135xf32, #tpu.memory_space<vmem>>, vector<32x135xf32>
    %1 = arith.truncf %0 : vector<32x135xf32> to vector<32x135xbf16>
    %c0_1 = arith.constant 0 : index
    %c0_2 = arith.constant 0 : index
    %2 = vector.load %arg2[%c0_1, %c0_2] : memref<135x15xbf16, #tpu.memory_space<vmem>>, vector<135x15xbf16>
    %cst = arith.constant dense<0.000000e+00> : vector<32x15xf32>
    %3 = tpu.matmul %1, %2, %cst {dimension_numbers = #tpu.dot_dimension_numbers<[1], [0], [0], [1], [0, 0, 1, 1], [], []>} : vector<32x135xbf16>, vector<135x15xbf16>, vector<32x15xf32> -> vector<32x15xf32>
    %c0_3 = arith.constant 0 : index
    %c0_4 = arith.constant 0 : index
    %4 = vector.load %arg3[%c0_3, %c0_4] : memref<1x15xf32, #tpu.memory_space<vmem>>, vector<1x15xf32>
    %5 = vector.broadcast %4 : vector<1x15xf32> to vector<32x15xf32>
    %6 = arith.addf %3, %5 : vector<32x15xf32>
    %c0_5 = arith.constant 0 : index
    %c0_6 = arith.constant 0 : index
    %7 = vector.load %arg4[%c0_5, %c0_6] : memref<1x15xf32, #tpu.memory_space<vmem>>, vector<1x15xf32>
    %8 = vector.broadcast %7 : vector<1x15xf32> to vector<32x15xf32>
    %9 = arith.mulf %6, %8 : vector<32x15xf32>
    %c0_7 = arith.constant 0 : index
    %c0_8 = arith.constant 0 : index
    %10 = vector.load %arg5[%c0_7, %c0_8] : memref<1x15xf32, #tpu.memory_space<vmem>>, vector<1x15xf32>
    %11 = vector.broadcast %10 : vector<1x15xf32> to vector<32x15xf32>
    %12 = arith.addf %9, %11 : vector<32x15xf32>
    %cst_9 = arith.constant 0.000000e+00 : f32
    %13 = vector.broadcast %cst_9 : f32 to vector<32x15xf32>
    %14 = arith.maximumf %12, %13 : vector<32x15xf32>
    %c0_10 = arith.constant 0 : index
    %c0_11 = arith.constant 0 : index
    %15 = vector.load %arg6[%c0_10, %c0_11] : memref<32x15xf32, #tpu.memory_space<vmem>>, vector<32x15xf32>
    tpu.vector_store %arg6[%c0_10, %c0_11], %14 {strides = array<i32>} : memref<32x15xf32, #tpu.memory_space<vmem>>, vector<32x15xf32>,
    return
  }
  func.func @transform_0(%arg0: i32) -> (i32, i32) {
    %c0_i32 = arith.constant 0 : i32
    %c0_i32_0 = arith.constant 0 : i32
    return %arg0, %c0_i32 : i32, i32
  }
  func.func @transform_1(%arg0: i32) -> (i32, i32) {
    %c0_i32 = arith.constant 0 : i32
    %c0_i32_0 = arith.constant 0 : i32
    %c0_i32_1 = arith.constant 0 : i32
    return %c0_i32, %c0_i32_0 : i32, i32
  }
  func.func @transform_2(%arg0: i32) -> (i32, i32) {
    %c0_i32 = arith.constant 0 : i32
    %c0_i32_0 = arith.constant 0 : i32
    %c0_i32_1 = arith.constant 0 : i32
    return %c0_i32, %c0_i32_0 : i32, i32
  }
  func.func @transform_3(%arg0: i32) -> (i32, i32) {
    %c0_i32 = arith.constant 0 : i32
    %c0_i32_0 = arith.constant 0 : i32
    %c0_i32_1 = arith.constant 0 : i32
    return %c0_i32, %c0_i32_0 : i32, i32
  }
  func.func @transform_4(%arg0: i32) -> (i32, i32) {
    %c0_i32 = arith.constant 0 : i32
    %c0_i32_0 = arith.constant 0 : i32
    %c0_i32_1 = arith.constant 0 : i32
    return %c0_i32, %c0_i32_0 : i32, i32
  }
  func.func @transform_5(%arg0: i32) -> (i32, i32) {
    %c0_i32 = arith.constant 0 : i32
    %c0_i32_0 = arith.constant 0 : i32
    return %arg0, %c0_i32 : i32, i32
  }
}

module attributes {stable_mosaic.version = 11 : i64} {
  func.func @_encoder_layer_kernel(%arg0: i32, %arg1: memref<1x16x16xf32, #tpu.memory_space<vmem>>, %arg2: memref<16x48xbf16, #tpu.memory_space<vmem>>, %arg3: memref<1x48xf32, #tpu.memory_space<vmem>>, %arg4: memref<16x16xf32, #tpu.memory_space<vmem>>, %arg5: memref<1x16xf32, #tpu.memory_space<vmem>>, %arg6: memref<16x2048xbf16, #tpu.memory_space<vmem>>, %arg7: memref<1x2048xf32, #tpu.memory_space<vmem>>, %arg8: memref<2048x16xbf16, #tpu.memory_space<vmem>>, %arg9: memref<1x16xf32, #tpu.memory_space<vmem>>, %arg10: memref<1x16xf32, #tpu.memory_space<vmem>>, %arg11: memref<1x16xf32, #tpu.memory_space<vmem>>, %arg12: memref<1x16xf32, #tpu.memory_space<vmem>>, %arg13: memref<1x16xf32, #tpu.memory_space<vmem>>, %arg14: memref<1x16x16xf32, #tpu.memory_space<vmem>>) attributes {dimension_semantics = [#tpu.dimension_semantics<parallel>], iteration_bounds = array<i64: 2>, scalar_prefetch = 0 : i64, scratch_operands = 0 : i64, tpu.core_type = #tpu.core_type<tc>, window_params = [{transform_indices = @transform_0, window_bounds = array<i64: 1, 16, 16>}, {pipeline_mode = #tpu.pipeline_mode<synchronous>, transform_indices = @transform_1, window_bounds = array<i64: 16, 48>}, {pipeline_mode = #tpu.pipeline_mode<synchronous>, transform_indices = @transform_2, window_bounds = array<i64: 1, 48>}, {pipeline_mode = #tpu.pipeline_mode<synchronous>, transform_indices = @transform_3, window_bounds = array<i64: 16, 16>}, {pipeline_mode = #tpu.pipeline_mode<synchronous>, transform_indices = @transform_4, window_bounds = array<i64: 1, 16>}, {pipeline_mode = #tpu.pipeline_mode<synchronous>, transform_indices = @transform_5, window_bounds = array<i64: 16, 2048>}, {pipeline_mode = #tpu.pipeline_mode<synchronous>, transform_indices = @transform_6, window_bounds = array<i64: 1, 2048>}, {pipeline_mode = #tpu.pipeline_mode<synchronous>, transform_indices = @transform_7, window_bounds = array<i64: 2048, 16>}, {pipeline_mode = #tpu.pipeline_mode<synchronous>, transform_indices = @transform_8, window_bounds = array<i64: 1, 16>}, {pipeline_mode = #tpu.pipeline_mode<synchronous>, transform_indices = @transform_9, window_bounds = array<i64: 1, 16>}, {pipeline_mode = #tpu.pipeline_mode<synchronous>, transform_indices = @transform_10, window_bounds = array<i64: 1, 16>}, {pipeline_mode = #tpu.pipeline_mode<synchronous>, transform_indices = @transform_11, window_bounds = array<i64: 1, 16>}, {pipeline_mode = #tpu.pipeline_mode<synchronous>, transform_indices = @transform_12, window_bounds = array<i64: 1, 16>}, {transform_indices = @transform_13, window_bounds = array<i64: 1, 16, 16>}]} {
    %c0 = arith.constant 0 : index
    %c0_0 = arith.constant 0 : index
    %c0_1 = arith.constant 0 : index
    %0 = vector.load %arg1[%c0, %c0_0, %c0_1] : memref<1x16x16xf32, #tpu.memory_space<vmem>>, vector<1x16x16xf32>
    %1 = vector.shape_cast %0 : vector<1x16x16xf32> to vector<16x16xf32>
    %2 = arith.truncf %1 : vector<16x16xf32> to vector<16x16xbf16>
    %c0_2 = arith.constant 0 : index
    %c0_3 = arith.constant 0 : index
    %3 = vector.load %arg2[%c0_2, %c0_3] : memref<16x48xbf16, #tpu.memory_space<vmem>>, vector<16x48xbf16>
    %cst = arith.constant dense<0.000000e+00> : vector<16x48xf32>
    %4 = tpu.matmul %2, %3, %cst {dimension_numbers = #tpu.dot_dimension_numbers<[1], [0], [0], [1], [0, 0, 1, 1], [], []>} : vector<16x16xbf16>, vector<16x48xbf16>, vector<16x48xf32> -> vector<16x48xf32>
    %c0_4 = arith.constant 0 : index
    %c0_5 = arith.constant 0 : index
    %5 = vector.load %arg3[%c0_4, %c0_5] : memref<1x48xf32, #tpu.memory_space<vmem>>, vector<1x48xf32>
    %6 = vector.broadcast %5 : vector<1x48xf32> to vector<16x48xf32>
    %7 = arith.addf %4, %6 : vector<16x48xf32>
    %c0_6 = arith.constant 0 : index
    %c0_7 = arith.constant 0 : index
    %8 = vector.load %arg4[%c0_6, %c0_7] : memref<16x16xf32, #tpu.memory_space<vmem>>, vector<16x16xf32>
    %cst_8 = arith.constant 0.000000e+00 : f32
    %9 = vector.broadcast %cst_8 : f32 to vector<16x16xf32>
    %10 = vector.extract_strided_slice %7 {offsets = [0, 0], sizes = [16, 8], strides = [1, 1]} : vector<16x48xf32> to vector<16x8xf32>
    %11 = vector.extract_strided_slice %7 {offsets = [0, 16], sizes = [16, 8], strides = [1, 1]} : vector<16x48xf32> to vector<16x8xf32>
    %12 = vector.extract_strided_slice %7 {offsets = [0, 32], sizes = [16, 8], strides = [1, 1]} : vector<16x48xf32> to vector<16x8xf32>
    %cst_9 = arith.constant dense<0.000000e+00> : vector<16x16xf32>
    %13 = tpu.matmul %10, %11, %cst_9 {dimension_numbers = #tpu.dot_dimension_numbers<[1], [1], [0], [0], [0, 0, 1, 0], [], []>} : vector<16x8xf32>, vector<16x8xf32>, vector<16x16xf32> -> vector<16x16xf32>
    %cst_10 = arith.constant 0.353553385 : f32
    %14 = vector.broadcast %cst_10 : f32 to vector<16x16xf32>
    %15 = arith.mulf %13, %14 : vector<16x16xf32>
    %cst_11 = arith.constant dense<0xFF800000> : vector<16xf32>
    %16 = vector.multi_reduction <maximumf>, %15, %cst_11 [1] : vector<16x16xf32> to vector<16xf32>
    %17 = vector.shape_cast %16 : vector<16xf32> to vector<16x1xf32>
    %18 = vector.broadcast %17 : vector<16x1xf32> to vector<16x16xf32>
    %19 = arith.subf %15, %18 : vector<16x16xf32>
    %20 = math.exp %19 : vector<16x16xf32>
    %cst_12 = arith.constant dense<0.000000e+00> : vector<16xf32>
    %21 = vector.multi_reduction <add>, %20, %cst_12 [1] : vector<16x16xf32> to vector<16xf32>
    %22 = vector.shape_cast %21 : vector<16xf32> to vector<16x1xf32>
    %23 = tpu.reciprocal %22 {approx = true} : vector<16x1xf32> -> vector<16x1xf32>
    %24 = vector.broadcast %23 : vector<16x1xf32> to vector<16x16xf32>
    %25 = arith.mulf %20, %24 : vector<16x16xf32>
    %cst_13 = arith.constant dense<0.000000e+00> : vector<16x8xf32>
    %26 = tpu.matmul %25, %12, %cst_13 {dimension_numbers = #tpu.dot_dimension_numbers<[1], [0], [0], [1], [0, 0, 1, 1], [], []>} : vector<16x16xf32>, vector<16x8xf32>, vector<16x8xf32> -> vector<16x8xf32>
    %27 = vector.extract_strided_slice %8 {offsets = [0, 0], sizes = [8, 16], strides = [1, 1]} : vector<16x16xf32> to vector<8x16xf32>
    %cst_14 = arith.constant dense<0.000000e+00> : vector<16x16xf32>
    %28 = tpu.matmul %26, %27, %cst_14 {dimension_numbers = #tpu.dot_dimension_numbers<[1], [0], [0], [1], [0, 0, 1, 1], [], []>} : vector<16x8xf32>, vector<8x16xf32>, vector<16x16xf32> -> vector<16x16xf32>
    %29 = arith.addf %9, %28 : vector<16x16xf32>
    %30 = vector.extract_strided_slice %7 {offsets = [0, 8], sizes = [16, 8], strides = [1, 1]} : vector<16x48xf32> to vector<16x8xf32>
    %31 = vector.extract_strided_slice %7 {offsets = [0, 24], sizes = [16, 8], strides = [1, 1]} : vector<16x48xf32> to vector<16x8xf32>
    %32 = vector.extract_strided_slice %7 {offsets = [0, 40], sizes = [16, 8], strides = [1, 1]} : vector<16x48xf32> to vector<16x8xf32>
    %cst_15 = arith.constant dense<0.000000e+00> : vector<16x16xf32>
    %33 = tpu.matmul %30, %31, %cst_15 {dimension_numbers = #tpu.dot_dimension_numbers<[1], [1], [0], [0], [0, 0, 1, 0], [], []>} : vector<16x8xf32>, vector<16x8xf32>, vector<16x16xf32> -> vector<16x16xf32>
    %cst_16 = arith.constant 0.353553385 : f32
    %34 = vector.broadcast %cst_16 : f32 to vector<16x16xf32>
    %35 = arith.mulf %33, %34 : vector<16x16xf32>
    %cst_17 = arith.constant dense<0xFF800000> : vector<16xf32>
    %36 = vector.multi_reduction <maximumf>, %35, %cst_17 [1] : vector<16x16xf32> to vector<16xf32>
    %37 = vector.shape_cast %36 : vector<16xf32> to vector<16x1xf32>
    %38 = vector.broadcast %37 : vector<16x1xf32> to vector<16x16xf32>
    %39 = arith.subf %35, %38 : vector<16x16xf32>
    %40 = math.exp %39 : vector<16x16xf32>
    %cst_18 = arith.constant dense<0.000000e+00> : vector<16xf32>
    %41 = vector.multi_reduction <add>, %40, %cst_18 [1] : vector<16x16xf32> to vector<16xf32>
    %42 = vector.shape_cast %41 : vector<16xf32> to vector<16x1xf32>
    %43 = tpu.reciprocal %42 {approx = true} : vector<16x1xf32> -> vector<16x1xf32>
    %44 = vector.broadcast %43 : vector<16x1xf32> to vector<16x16xf32>
    %45 = arith.mulf %40, %44 : vector<16x16xf32>
    %cst_19 = arith.constant dense<0.000000e+00> : vector<16x8xf32>
    %46 = tpu.matmul %45, %32, %cst_19 {dimension_numbers = #tpu.dot_dimension_numbers<[1], [0], [0], [1], [0, 0, 1, 1], [], []>} : vector<16x16xf32>, vector<16x8xf32>, vector<16x8xf32> -> vector<16x8xf32>
    %47 = vector.extract_strided_slice %8 {offsets = [8, 0], sizes = [8, 16], strides = [1, 1]} : vector<16x16xf32> to vector<8x16xf32>
    %cst_20 = arith.constant dense<0.000000e+00> : vector<16x16xf32>
    %48 = tpu.matmul %46, %47, %cst_20 {dimension_numbers = #tpu.dot_dimension_numbers<[1], [0], [0], [1], [0, 0, 1, 1], [], []>} : vector<16x8xf32>, vector<8x16xf32>, vector<16x16xf32> -> vector<16x16xf32>
    %49 = arith.addf %29, %48 : vector<16x16xf32>
    %c0_21 = arith.constant 0 : index
    %c0_22 = arith.constant 0 : index
    %50 = vector.load %arg5[%c0_21, %c0_22] : memref<1x16xf32, #tpu.memory_space<vmem>>, vector<1x16xf32>
    %51 = vector.broadcast %50 : vector<1x16xf32> to vector<16x16xf32>
    %52 = arith.addf %49, %51 : vector<16x16xf32>
    %53 = arith.addf %1, %52 : vector<16x16xf32>
    %c0_23 = arith.constant 0 : index
    %c0_24 = arith.constant 0 : index
    %54 = vector.load %arg10[%c0_23, %c0_24] : memref<1x16xf32, #tpu.memory_space<vmem>>, vector<1x16xf32>
    %c0_25 = arith.constant 0 : index
    %c0_26 = arith.constant 0 : index
    %55 = vector.load %arg11[%c0_25, %c0_26] : memref<1x16xf32, #tpu.memory_space<vmem>>, vector<1x16xf32>
    %cst_27 = arith.constant dense<0.000000e+00> : vector<16xf32>
    %56 = vector.multi_reduction <add>, %53, %cst_27 [1] : vector<16x16xf32> to vector<16xf32>
    %57 = vector.shape_cast %56 : vector<16xf32> to vector<16x1xf32>
    %cst_28 = arith.constant 1.600000e+01 : f32
    %58 = vector.broadcast %cst_28 : f32 to vector<16x1xf32>
    %59 = arith.divf %57, %58 : vector<16x1xf32>
    %60 = vector.broadcast %59 : vector<16x1xf32> to vector<16x16xf32>
    %61 = arith.subf %53, %60 : vector<16x16xf32>
    %62 = vector.broadcast %59 : vector<16x1xf32> to vector<16x16xf32>
    %63 = arith.subf %53, %62 : vector<16x16xf32>
    %64 = arith.mulf %61, %63 : vector<16x16xf32>
    %cst_29 = arith.constant dense<0.000000e+00> : vector<16xf32>
    %65 = vector.multi_reduction <add>, %64, %cst_29 [1] : vector<16x16xf32> to vector<16xf32>
    %66 = vector.shape_cast %65 : vector<16xf32> to vector<16x1xf32>
    %cst_30 = arith.constant 1.600000e+01 : f32
    %67 = vector.broadcast %cst_30 : f32 to vector<16x1xf32>
    %68 = arith.divf %66, %67 : vector<16x1xf32>
    %69 = vector.broadcast %59 : vector<16x1xf32> to vector<16x16xf32>
    %70 = arith.subf %53, %69 : vector<16x16xf32>
    %cst_31 = arith.constant 9.99999974E-6 : f32
    %71 = vector.broadcast %cst_31 : f32 to vector<16x1xf32>
    %72 = arith.addf %68, %71 : vector<16x1xf32>
    %73 = math.rsqrt %72 : vector<16x1xf32>
    %74 = vector.broadcast %73 : vector<16x1xf32> to vector<16x16xf32>
    %75 = arith.mulf %70, %74 : vector<16x16xf32>
    %76 = vector.broadcast %54 : vector<1x16xf32> to vector<16x16xf32>
    %77 = arith.mulf %75, %76 : vector<16x16xf32>
    %78 = vector.broadcast %55 : vector<1x16xf32> to vector<16x16xf32>
    %79 = arith.addf %77, %78 : vector<16x16xf32>
    %80 = arith.truncf %79 : vector<16x16xf32> to vector<16x16xbf16>
    %c0_32 = arith.constant 0 : index
    %c0_33 = arith.constant 0 : index
    %81 = vector.load %arg6[%c0_32, %c0_33] : memref<16x2048xbf16, #tpu.memory_space<vmem>>, vector<16x2048xbf16>
    %cst_34 = arith.constant dense<0.000000e+00> : vector<16x2048xf32>
    %82 = tpu.matmul %80, %81, %cst_34 {dimension_numbers = #tpu.dot_dimension_numbers<[1], [0], [0], [1], [0, 0, 1, 1], [], []>} : vector<16x16xbf16>, vector<16x2048xbf16>, vector<16x2048xf32> -> vector<16x2048xf32>
    %c0_35 = arith.constant 0 : index
    %c0_36 = arith.constant 0 : index
    %83 = vector.load %arg7[%c0_35, %c0_36] : memref<1x2048xf32, #tpu.memory_space<vmem>>, vector<1x2048xf32>
    %84 = vector.broadcast %83 : vector<1x2048xf32> to vector<16x2048xf32>
    %85 = arith.addf %82, %84 : vector<16x2048xf32>
    %cst_37 = arith.constant 0.000000e+00 : f32
    %86 = vector.broadcast %cst_37 : f32 to vector<16x2048xf32>
    %87 = arith.maximumf %85, %86 : vector<16x2048xf32>
    %88 = arith.truncf %87 : vector<16x2048xf32> to vector<16x2048xbf16>
    %c0_38 = arith.constant 0 : index
    %c0_39 = arith.constant 0 : index
    %89 = vector.load %arg8[%c0_38, %c0_39] : memref<2048x16xbf16, #tpu.memory_space<vmem>>, vector<2048x16xbf16>
    %cst_40 = arith.constant dense<0.000000e+00> : vector<16x16xf32>
    %90 = tpu.matmul %88, %89, %cst_40 {dimension_numbers = #tpu.dot_dimension_numbers<[1], [0], [0], [1], [0, 0, 1, 1], [], []>} : vector<16x2048xbf16>, vector<2048x16xbf16>, vector<16x16xf32> -> vector<16x16xf32>
    %c0_41 = arith.constant 0 : index
    %c0_42 = arith.constant 0 : index
    %91 = vector.load %arg9[%c0_41, %c0_42] : memref<1x16xf32, #tpu.memory_space<vmem>>, vector<1x16xf32>
    %92 = vector.broadcast %91 : vector<1x16xf32> to vector<16x16xf32>
    %93 = arith.addf %90, %92 : vector<16x16xf32>
    %94 = arith.addf %79, %93 : vector<16x16xf32>
    %c0_43 = arith.constant 0 : index
    %c0_44 = arith.constant 0 : index
    %95 = vector.load %arg12[%c0_43, %c0_44] : memref<1x16xf32, #tpu.memory_space<vmem>>, vector<1x16xf32>
    %c0_45 = arith.constant 0 : index
    %c0_46 = arith.constant 0 : index
    %96 = vector.load %arg13[%c0_45, %c0_46] : memref<1x16xf32, #tpu.memory_space<vmem>>, vector<1x16xf32>
    %cst_47 = arith.constant dense<0.000000e+00> : vector<16xf32>
    %97 = vector.multi_reduction <add>, %94, %cst_47 [1] : vector<16x16xf32> to vector<16xf32>
    %98 = vector.shape_cast %97 : vector<16xf32> to vector<16x1xf32>
    %cst_48 = arith.constant 1.600000e+01 : f32
    %99 = vector.broadcast %cst_48 : f32 to vector<16x1xf32>
    %100 = arith.divf %98, %99 : vector<16x1xf32>
    %101 = vector.broadcast %100 : vector<16x1xf32> to vector<16x16xf32>
    %102 = arith.subf %94, %101 : vector<16x16xf32>
    %103 = vector.broadcast %100 : vector<16x1xf32> to vector<16x16xf32>
    %104 = arith.subf %94, %103 : vector<16x16xf32>
    %105 = arith.mulf %102, %104 : vector<16x16xf32>
    %cst_49 = arith.constant dense<0.000000e+00> : vector<16xf32>
    %106 = vector.multi_reduction <add>, %105, %cst_49 [1] : vector<16x16xf32> to vector<16xf32>
    %107 = vector.shape_cast %106 : vector<16xf32> to vector<16x1xf32>
    %cst_50 = arith.constant 1.600000e+01 : f32
    %108 = vector.broadcast %cst_50 : f32 to vector<16x1xf32>
    %109 = arith.divf %107, %108 : vector<16x1xf32>
    %110 = vector.broadcast %100 : vector<16x1xf32> to vector<16x16xf32>
    %111 = arith.subf %94, %110 : vector<16x16xf32>
    %cst_51 = arith.constant 9.99999974E-6 : f32
    %112 = vector.broadcast %cst_51 : f32 to vector<16x1xf32>
    %113 = arith.addf %109, %112 : vector<16x1xf32>
    %114 = math.rsqrt %113 : vector<16x1xf32>
    %115 = vector.broadcast %114 : vector<16x1xf32> to vector<16x16xf32>
    %116 = arith.mulf %111, %115 : vector<16x16xf32>
    %117 = vector.broadcast %95 : vector<1x16xf32> to vector<16x16xf32>
    %118 = arith.mulf %116, %117 : vector<16x16xf32>
    %119 = vector.broadcast %96 : vector<1x16xf32> to vector<16x16xf32>
    %120 = arith.addf %118, %119 : vector<16x16xf32>
    %c0_52 = arith.constant 0 : index
    %c0_53 = arith.constant 0 : index
    %c0_54 = arith.constant 0 : index
    %121 = vector.load %arg14[%c0_52, %c0_53, %c0_54] : memref<1x16x16xf32, #tpu.memory_space<vmem>>, vector<1x16x16xf32>
    %122 = vector.shape_cast %121 : vector<1x16x16xf32> to vector<16x16xf32>
    %123 = vector.shape_cast %120 : vector<16x16xf32> to vector<1x16x16xf32>
    tpu.vector_store %arg14[%c0_52, %c0_53, %c0_54], %123 {strides = array<i32>} : memref<1x16x16xf32, #tpu.memory_space<vmem>>, vector<1x16x16xf32>,
    return
  }
  func.func @transform_0(%arg0: i32) -> (i32, i32, i32) {
    %c0_i32 = arith.constant 0 : i32
    %c0_i32_0 = arith.constant 0 : i32
    %c0_i32_1 = arith.constant 0 : i32
    return %arg0, %c0_i32, %c0_i32_0 : i32, i32, i32
  }
  func.func @transform_1(%arg0: i32) -> (i32, i32) {
    %c0_i32 = arith.constant 0 : i32
    %c0_i32_0 = arith.constant 0 : i32
    %c0_i32_1 = arith.constant 0 : i32
    return %c0_i32, %c0_i32_0 : i32, i32
  }
  func.func @transform_2(%arg0: i32) -> (i32, i32) {
    %c0_i32 = arith.constant 0 : i32
    %c0_i32_0 = arith.constant 0 : i32
    %c0_i32_1 = arith.constant 0 : i32
    return %c0_i32, %c0_i32_0 : i32, i32
  }
  func.func @transform_3(%arg0: i32) -> (i32, i32) {
    %c0_i32 = arith.constant 0 : i32
    %c0_i32_0 = arith.constant 0 : i32
    %c0_i32_1 = arith.constant 0 : i32
    return %c0_i32, %c0_i32_0 : i32, i32
  }
  func.func @transform_4(%arg0: i32) -> (i32, i32) {
    %c0_i32 = arith.constant 0 : i32
    %c0_i32_0 = arith.constant 0 : i32
    %c0_i32_1 = arith.constant 0 : i32
    return %c0_i32, %c0_i32_0 : i32, i32
  }
  func.func @transform_5(%arg0: i32) -> (i32, i32) {
    %c0_i32 = arith.constant 0 : i32
    %c0_i32_0 = arith.constant 0 : i32
    %c0_i32_1 = arith.constant 0 : i32
    return %c0_i32, %c0_i32_0 : i32, i32
  }
  func.func @transform_6(%arg0: i32) -> (i32, i32) {
    %c0_i32 = arith.constant 0 : i32
    %c0_i32_0 = arith.constant 0 : i32
    %c0_i32_1 = arith.constant 0 : i32
    return %c0_i32, %c0_i32_0 : i32, i32
  }
  func.func @transform_7(%arg0: i32) -> (i32, i32) {
    %c0_i32 = arith.constant 0 : i32
    %c0_i32_0 = arith.constant 0 : i32
    %c0_i32_1 = arith.constant 0 : i32
    return %c0_i32, %c0_i32_0 : i32, i32
  }
  func.func @transform_8(%arg0: i32) -> (i32, i32) {
    %c0_i32 = arith.constant 0 : i32
    %c0_i32_0 = arith.constant 0 : i32
    %c0_i32_1 = arith.constant 0 : i32
    return %c0_i32, %c0_i32_0 : i32, i32
  }
  func.func @transform_9(%arg0: i32) -> (i32, i32) {
    %c0_i32 = arith.constant 0 : i32
    %c0_i32_0 = arith.constant 0 : i32
    %c0_i32_1 = arith.constant 0 : i32
    return %c0_i32, %c0_i32_0 : i32, i32
  }
  func.func @transform_10(%arg0: i32) -> (i32, i32) {
    %c0_i32 = arith.constant 0 : i32
    %c0_i32_0 = arith.constant 0 : i32
    %c0_i32_1 = arith.constant 0 : i32
    return %c0_i32, %c0_i32_0 : i32, i32
  }
  func.func @transform_11(%arg0: i32) -> (i32, i32) {
    %c0_i32 = arith.constant 0 : i32
    %c0_i32_0 = arith.constant 0 : i32
    %c0_i32_1 = arith.constant 0 : i32
    return %c0_i32, %c0_i32_0 : i32, i32
  }
  func.func @transform_12(%arg0: i32) -> (i32, i32) {
    %c0_i32 = arith.constant 0 : i32
    %c0_i32_0 = arith.constant 0 : i32
    %c0_i32_1 = arith.constant 0 : i32
    return %c0_i32, %c0_i32_0 : i32, i32
  }
  func.func @transform_13(%arg0: i32) -> (i32, i32, i32) {
    %c0_i32 = arith.constant 0 : i32
    %c0_i32_0 = arith.constant 0 : i32
    %c0_i32_1 = arith.constant 0 : i32
    return %arg0, %c0_i32, %c0_i32_0 : i32, i32, i32
  }
}

module attributes {stable_mosaic.version = 11 : i64} {
  func.func @_contact_kernel(%arg0: i32, %arg1: i32, %arg2: i32, %arg3: memref<1x16x16xf32, #tpu.memory_space<vmem>>, %arg4: memref<1x16x16xf32, #tpu.memory_space<vmem>>, %arg5: memref<16x16x16xf32, #tpu.memory_space<vmem>>, %arg6: memref<16x16x16xf32, #tpu.memory_space<vmem>>, %arg7: memref<2x16x16xf32, #tpu.memory_space<vmem>>, %arg8: memref<1x16x16xf32, #tpu.memory_space<vmem>>) attributes {dimension_semantics = [#tpu.dimension_semantics<parallel>, #tpu.dimension_semantics<parallel>, #tpu.dimension_semantics<parallel>], iteration_bounds = array<i64: 2, 1, 1>, scalar_prefetch = 0 : i64, scratch_operands = 0 : i64, tpu.core_type = #tpu.core_type<tc>, window_params = [{transform_indices = @transform_0, window_bounds = array<i64: 1, 16, 16>}, {transform_indices = @transform_1, window_bounds = array<i64: 1, 16, 16>}, {transform_indices = @transform_2, window_bounds = array<i64: 16, 16, 16>}, {transform_indices = @transform_3, window_bounds = array<i64: 16, 16, 16>}, {transform_indices = @transform_4, window_bounds = array<i64: 2, 16, 16>}, {transform_indices = @transform_5, window_bounds = array<i64: 1, 16, 16>}]} {
    %c0 = arith.constant 0 : index
    %c0_0 = arith.constant 0 : index
    %c0_1 = arith.constant 0 : index
    %0 = vector.load %arg3[%c0, %c0_0, %c0_1] : memref<1x16x16xf32, #tpu.memory_space<vmem>>, vector<1x16x16xf32>
    %1 = vector.shape_cast %0 : vector<1x16x16xf32> to vector<16x16xf32>
    %c0_2 = arith.constant 0 : index
    %c0_3 = arith.constant 0 : index
    %c0_4 = arith.constant 0 : index
    %2 = vector.load %arg4[%c0_2, %c0_3, %c0_4] : memref<1x16x16xf32, #tpu.memory_space<vmem>>, vector<1x16x16xf32>
    %3 = vector.shape_cast %2 : vector<1x16x16xf32> to vector<16x16xf32>
    %c0_5 = arith.constant 0 : index
    %c0_6 = arith.constant 0 : index
    %c0_7 = arith.constant 0 : index
    %4 = vector.load %arg5[%c0_5, %c0_6, %c0_7] : memref<16x16x16xf32, #tpu.memory_space<vmem>>, vector<16x16x16xf32>
    %c0_8 = arith.constant 0 : index
    %c0_9 = arith.constant 0 : index
    %c0_10 = arith.constant 0 : index
    %5 = vector.load %arg6[%c0_8, %c0_9, %c0_10] : memref<16x16x16xf32, #tpu.memory_space<vmem>>, vector<16x16x16xf32>
    %c16_i32 = arith.constant 16 : i32
    %6 = arith.muli %arg1, %c16_i32 : i32
    %7 = tpu.iota {dimensions = array<i32: 0>} : vector<16x16xi32>
    %8 = vector.broadcast %6 : i32 to vector<16x16xi32>
    %9 = arith.addi %8, %7 : vector<16x16xi32>
    %c16_i32_11 = arith.constant 16 : i32
    %10 = arith.muli %arg2, %c16_i32_11 : i32
    %11 = tpu.iota {dimensions = array<i32: 1>} : vector<16x16xi32>
    %12 = vector.broadcast %10 : i32 to vector<16x16xi32>
    %13 = arith.addi %12, %11 : vector<16x16xi32>
    %14 = arith.cmpi sle, %9, %13 : vector<16x16xi32>
    %15 = vector.shape_cast %14 : vector<16x16xi1> to vector<1x16x16xi1>
    %16 = vector.shape_cast %15 : vector<1x16x16xi1> to vector<1x16x16xi1>
    %17 = vector.broadcast %16 : vector<1x16x16xi1> to vector<16x16x16xi1>
    %18 = vector.shape_cast %1 : vector<16x16xf32> to vector<16x16x1xf32>
    %19 = vector.shape_cast %18 : vector<16x16x1xf32> to vector<16x16x1xf32>
    %20 = vector.broadcast %19 : vector<16x16x1xf32> to vector<16x16x16xf32>
    %21 = vector.shape_cast %3 : vector<16x16xf32> to vector<16x1x16xf32>
    %22 = vector.shape_cast %21 : vector<16x1x16xf32> to vector<16x1x16xf32>
    %23 = vector.broadcast %22 : vector<16x1x16xf32> to vector<16x16x16xf32>
    %24 = arith.select %17, %20, %23 : vector<16x16x16xi1>, vector<16x16x16xf32>
    %25 = arith.select %17, %23, %20 : vector<16x16x16xi1>, vector<16x16x16xf32>
    %26 = arith.mulf %4, %24 : vector<16x16x16xf32>
    %27 = arith.mulf %5, %25 : vector<16x16x16xf32>
    %28 = arith.addf %26, %27 : vector<16x16x16xf32>
    %cst = arith.constant dense<0.000000e+00> : vector<16x16xf32>
    %29 = vector.multi_reduction <add>, %28, %cst [0] : vector<16x16x16xf32> to vector<16x16xf32>
    %c0_12 = arith.constant 0 : index
    %c0_13 = arith.constant 0 : index
    %c0_14 = arith.constant 0 : index
    %30 = vector.load %arg7[%c0_12, %c0_13, %c0_14] : memref<2x16x16xf32, #tpu.memory_space<vmem>>, vector<1x16x16xf32>
    %31 = vector.shape_cast %30 : vector<1x16x16xf32> to vector<16x16xf32>
    %c1_i32 = arith.constant 1 : i32
    %32 = vector.broadcast %c1_i32 : i32 to vector<16x16xi32>
    %33 = arith.addi %9, %32 : vector<16x16xi32>
    %34 = arith.sitofp %33 : vector<16x16xi32> to vector<16x16xf32>
    %cst_15 = arith.constant 6.250000e-02 : f32
    %35 = vector.broadcast %cst_15 : f32 to vector<16x16xf32>
    %36 = arith.mulf %34, %35 : vector<16x16xf32>
    %37 = arith.mulf %31, %36 : vector<16x16xf32>
    %38 = arith.addf %29, %37 : vector<16x16xf32>
    %c1 = arith.constant 1 : index
    %c0_16 = arith.constant 0 : index
    %c0_17 = arith.constant 0 : index
    %39 = vector.load %arg7[%c1, %c0_16, %c0_17] : memref<2x16x16xf32, #tpu.memory_space<vmem>>, vector<1x16x16xf32>
    %40 = vector.shape_cast %39 : vector<1x16x16xf32> to vector<16x16xf32>
    %c1_i32_18 = arith.constant 1 : i32
    %41 = vector.broadcast %c1_i32_18 : i32 to vector<16x16xi32>
    %42 = arith.addi %13, %41 : vector<16x16xi32>
    %43 = arith.sitofp %42 : vector<16x16xi32> to vector<16x16xf32>
    %cst_19 = arith.constant 6.250000e-02 : f32
    %44 = vector.broadcast %cst_19 : f32 to vector<16x16xf32>
    %45 = arith.mulf %43, %44 : vector<16x16xf32>
    %46 = arith.mulf %40, %45 : vector<16x16xf32>
    %47 = arith.addf %38, %46 : vector<16x16xf32>
    %c0_20 = arith.constant 0 : index
    %c0_21 = arith.constant 0 : index
    %c0_22 = arith.constant 0 : index
    %48 = vector.load %arg8[%c0_20, %c0_21, %c0_22] : memref<1x16x16xf32, #tpu.memory_space<vmem>>, vector<1x16x16xf32>
    %49 = vector.shape_cast %48 : vector<1x16x16xf32> to vector<16x16xf32>
    %50 = vector.shape_cast %47 : vector<16x16xf32> to vector<1x16x16xf32>
    tpu.vector_store %arg8[%c0_20, %c0_21, %c0_22], %50 {strides = array<i32>} : memref<1x16x16xf32, #tpu.memory_space<vmem>>, vector<1x16x16xf32>,
    return
  }
  func.func @transform_0(%arg0: i32, %arg1: i32, %arg2: i32) -> (i32, i32, i32) {
    %c0_i32 = arith.constant 0 : i32
    %c0_i32_0 = arith.constant 0 : i32
    return %arg0, %c0_i32, %arg1 : i32, i32, i32
  }
  func.func @transform_1(%arg0: i32, %arg1: i32, %arg2: i32) -> (i32, i32, i32) {
    %c0_i32 = arith.constant 0 : i32
    %c0_i32_0 = arith.constant 0 : i32
    return %arg0, %c0_i32, %arg2 : i32, i32, i32
  }
  func.func @transform_2(%arg0: i32, %arg1: i32, %arg2: i32) -> (i32, i32, i32) {
    %c0_i32 = arith.constant 0 : i32
    %c0_i32_0 = arith.constant 0 : i32
    return %c0_i32, %arg1, %arg2 : i32, i32, i32
  }
  func.func @transform_3(%arg0: i32, %arg1: i32, %arg2: i32) -> (i32, i32, i32) {
    %c0_i32 = arith.constant 0 : i32
    %c0_i32_0 = arith.constant 0 : i32
    return %c0_i32, %arg1, %arg2 : i32, i32, i32
  }
  func.func @transform_4(%arg0: i32, %arg1: i32, %arg2: i32) -> (i32, i32, i32) {
    %c0_i32 = arith.constant 0 : i32
    %c0_i32_0 = arith.constant 0 : i32
    return %c0_i32, %arg1, %arg2 : i32, i32, i32
  }
  func.func @transform_5(%arg0: i32, %arg1: i32, %arg2: i32) -> (i32, i32, i32) {
    %c0_i32 = arith.constant 0 : i32
    return %arg0, %arg1, %arg2 : i32, i32, i32
  }
}

</mosaic_0001>

<bundles_post_ra>
// kernel: forward.6
= control target key start
LH: loop header
LB: loop body
LE: loop exit
PB: predicated region body
PF: predicated region fallthrough
CT: control target
= control target key end

     0   :  { %vm61_vm0 = vcmask 1041408   ;;  %vm54_vm1 = vcmask 293888   ;;  %vm140_vm2 = vcmask 121856   ;;  %s248_s1 = inlined_call_operand.vmem [shape: bf16[36,15], index: 1, kind: input, shape index: {}]   ;;  %s249_s0 = inlined_call_operand.vmem [shape: f32[32,36], index: 0, kind: input, shape index: {}]   ;;  %s250_s2 = inlined_call_operand.vmem [shape: f32[1,15], index: 2, kind: input, shape index: {}]   ;;  %s251_s3 = inlined_call_operand.vmem [shape: f32[1,15], index: 3, kind: input, shape index: {}]   ;;  %s252_s4 = inlined_call_operand.vmem [shape: f32[1,15], index: 4, kind: input, shape index: {}]   ;;  %s253_s5 = inlined_call_operand.vmem [shape: f32[32,15], index: 5, kind: output, shape index: {}]  }
   0x1   :  { %v173_v0 = vld [vmem:[%s248_s1 + $0x10] ss:$0 sps:$4 sm:$0x33]   ;;  %v174_v1 = vld [vmem:[%s248_s1 + $0x8] sm:$0xff]   ;;  %v21_v3 = vld [vmem:[%s249_s0] sm:$0xff] }
   0x2   :  { %172 = vmatprep.subr.msk.bf16.mxu0 %vm61_vm0, %v173_v0  ;;  %v63_v2 = vsel %vm61_vm0, %v173_v0, 0  ;;  %v22_v4 = vld [vmem:[%s249_s0 + $0x8] sm:$0xff]  ;;  %v175_v5 = vld [vmem:[%s248_s1] sm:$0xff]   ;;  %v23_v7 = vld [vmem:[%s249_s0 + $0x10] sm:$0xff] }
   0x3   :  { %163 = vmatpush3.bf16.msra.mxu0 %v63_v2  ;;  %v25_v6 = vpack.c.bf16 %v22_v4, %v21_v3  ;;  %v24_v8 = vld [vmem:[%s249_s0 + $0x18] sm:$0xff]  ;;  %v149_v10 = vld [vmem:[%s250_s2] ss:$0 sm:$0xff] }
   0x4   :  { %164 = vmatprep.subr.bf16.mxu0 %v174_v1  ;;  %v26_v9 = vpack.c.bf16 %v24_v8, %v23_v7  ;;  %v155_v12 = vld [vmem:[%s251_s3] ss:$0 sm:$0xff] }
   0x5   :  { %168 = vmatprep.mubr.msk.bf16.mxu0 %vm54_vm1, %v25_v6  ;;  %v156_v14 = vld [vmem:[%s252_s4] ss:$0 sm:$0xff] }
   0x7   :  { %165 = vmatpush3.bf16.msra.mxu0 %v174_v1 }
   0x8   :  { %166 = vmatprep.subr.bf16.mxu0 %v175_v5 }
   0xb   :  { %167 = vmatpush3.bf16.msra.mxu0 %v175_v5 }
   0xe   :  { %169 = vmatmul.mubr.msk.bf16.vlgmr.msra.gmra.mxu0 %vm54_vm1, %v26_v9 }
  0xce   :  { %v170_v11 = vpop.f32.mrf.mxu0 }
  0xcf   :  { %v108_v13 = vadd.f32 %v170_v11, %v149_v10 }
  0xd0   :  { %v99_v15 = vpop.f32.mrf.mxu0 }
  0xd1   :  { %v123_v16 = vmul.f32 %v155_v12, %v108_v13  ;;  %v100_v17 = vadd.f32 %v149_v10, %v99_v15 }
  0xd2   :  { %v171_v18 = vpop.f32.mrf.mxu0 }
  0xd3   :  { %v134_v19 = vadd.f32 %v156_v14, %v123_v16  ;;  %v121_v20 = vmul.f32 %v155_v12, %v100_v17  ;;  %v111_v21 = vadd.f32 %v171_v18, %v149_v10 }
  0xd4   :  { %v102_v22 = vpop.f32.mrf.mxu0 }
  0xd5   :  { %v138_v23 = vmax.f32 %v134_v19, 0.0  ;;  %v132_v24 = vadd.f32 %v156_v14, %v121_v20  ;;  %v124_v25 = vmul.f32 %v155_v12, %v111_v21  ;;  %v103_v26 = vadd.f32 %v149_v10, %v102_v22 }
  0xd7   :  { %143 = vst.msk [vmem:[%s253_s5 + $0x10] sm:$0xff] %vm140_vm2, %v138_v23  ;;  %v136_v27 = vmax.f32 %v132_v24, 0.0  ;;  %v135_v28 = vadd.f32 %v156_v14, %v124_v25  ;;  %v122_v29 = vmul.f32 %v155_v12, %v103_v26 }
  0xd9   :  { %141 = vst.msk [vmem:[%s253_s5] sm:$0xff] %vm140_vm2, %v136_v27  ;;  %v139_v30 = vmax.f32 %v135_v28, 0.0  ;;  %v133_v31 = vadd.f32 %v156_v14, %v122_v29 }
  0xdb   :  { %144 = vst.msk [vmem:[%s253_s5 + $0x18] sm:$0xff] %vm140_vm2, %v139_v30  ;;  %v137_v32 = vmax.f32 %v133_v31, 0.0 }
  0xdd   :  { %142 = vst.msk [vmem:[%s253_s5 + $0x8] sm:$0xff] %vm140_vm2, %v137_v32 }

// kernel: forward.7
= control target key start
LH: loop header
LB: loop body
LE: loop exit
PB: predicated region body
PF: predicated region fallthrough
CT: control target
= control target key end

     0   :  { %v249_v0 = vmov 0   ;;  %vm108_vm0 = vcmask 56320   ;;  %vm115_vm1 = vcmask 1042432   ;;  %vm116_vm2 = vcmask 1043456   ;;  %s353_s1 = inlined_call_operand.vmem [shape: bf16[135,15], index: 1, kind: input, shape index: {}]   ;;  %s354_s0 = inlined_call_operand.vmem [shape: f32[32,135], index: 0, kind: input, shape index: {}]   ;;  %s355_s2 = inlined_call_operand.vmem [shape: f32[1,15], index: 2, kind: input, shape index: {}]   ;;  %s356_s3 = inlined_call_operand.vmem [shape: f32[1,15], index: 3, kind: input, shape index: {}]   ;;  %s357_s4 = inlined_call_operand.vmem [shape: f32[1,15], index: 4, kind: input, shape index: {}]   ;;  %s358_s5 = inlined_call_operand.vmem [shape: f32[32,15], index: 5, kind: output, shape index: {}]  }
   0x1   :  { %122 = vmatprep.subr.bf16.mxu0 %v249_v0  ;;  %220 = vmatprep.subr.bf16.mxu1 %v249_v0  ;;  %v240_v1 = vld [vmem:[%s353_s1 + $0x38] sm:$0xff]   ;;  %v241_v2 = vld [vmem:[%s353_s1 + $0x30] sm:$0xff]   ;;  %v242_v3 = vld [vmem:[%s353_s1 + $0x28] sm:$0xff]   ;;  %v250_v14 = vmov 65535   ;;  %vm197_vm3 = vcmask 121856  }
   0x2   :  { %123 = vmatpush1.bf16.msra.mxu0 %v240_v1  ;;  %229 = vmatpush1.bf16.msra.mxu1 %v240_v1  ;;  %v22_v4 = vld [vmem:[%s354_s0 + $0x8] sm:$0xff]  ;;  %v24_v5 = vld [vmem:[%s354_s0 + $0x18] sm:$0xff]  ;;  %v243_v8 = vld [vmem:[%s353_s1 + $0x20] sm:$0xff]   ;;  %v117_v15 = vsel %vm115_vm1, 4294967295, %v250_v14 }
   0x3   :  { %124 = vmatprep.subr.bf16.mxu0 %v249_v0  ;;  %221 = vmatprep.subr.bf16.mxu1 %v249_v0  ;;  %v26_v6 = vld [vmem:[%s354_s0 + $0x28] sm:$0xff]  ;;  %v28_v7 = vld [vmem:[%s354_s0 + $0x38] sm:$0xff]  ;;  %v30_v9 = vpack.c.bf16 %v24_v5, %v22_v4  ;;  %v245_v12 = vld [vmem:[%s353_s1 + $0x10] sm:$0xff]   ;;  %v118_v18 = vsel %vm116_vm2, %v117_v15, 0 }
   0x4   :  { %v32_v10 = vpack.c.bf16 %v28_v7, %v26_v6  ;;  %v244_v11 = vld [vmem:[%s353_s1 + $0x18] sm:$0xff]   ;;  %v246_v13 = vld [vmem:[%s353_s1 + $0x8] sm:$0xff]   ;;  %v247_v16 = vld [vmem:[%s353_s1] sm:$0xff]  }
   0x5   :  { %216 = vmatprep.mubr.msk.bf16.mxu0 %vm108_vm0, %v30_v9  ;;  %v248_v17 = vld [vmem:[%s353_s1 + $0x40] ss:$0 sps:$4 sm:$0xff]   ;;  %v23_v21 = vld [vmem:[%s354_s0 + $0x10] sm:$0xff] }
   0x6   :  { %125 = vmatpush1.bf16.msra.mxu0 %v241_v2  ;;  %230 = vmatpush1.bf16.msra.mxu1 %v241_v2  ;;  %v21_v19 = vld [vmem:[%s354_s0] sm:$0xff]  ;;  %v120_v20 = vand.u32 %v248_v17, %v118_v18  ;;  %v27_v23 = vld [vmem:[%s354_s0 + $0x30] sm:$0xff] }
   0x7   :  { %126 = vmatprep.subr.bf16.mxu0 %v249_v0  ;;  %222 = vmatprep.subr.bf16.mxu1 %v249_v0  ;;  %v25_v22 = vld [vmem:[%s354_s0 + $0x20] sm:$0xff]  ;;  %v29_v24 = vpack.c.bf16 %v23_v21, %v21_v19 }
   0x8   :  { %217 = vmatprep.mubr.msk.bf16.mxu1 %vm108_vm0, %v32_v10  ;;  %v31_v25 = vpack.c.bf16 %v27_v23, %v25_v22  ;;  %v206_v26 = vld [vmem:[%s355_s2] ss:$0 sm:$0xff] }
   0x9   :  { %v218_v28 = vld [vmem:[%s356_s3] ss:$0 sm:$0xff] }
   0xa   :  { %127 = vmatpush1.bf16.msra.mxu0 %v242_v3  ;;  %231 = vmatpush1.bf16.msra.mxu1 %v242_v3  ;;  %v219_v32 = vld [vmem:[%s357_s4] ss:$0 sm:$0xff] }
   0xb   :  { %128 = vmatprep.subr.bf16.mxu0 %v249_v0  ;;  %223 = vmatprep.subr.bf16.mxu1 %v249_v0 }
   0xe   :  { %129 = vmatpush1.bf16.msra.mxu0 %v243_v8  ;;  %232 = vmatpush1.bf16.msra.mxu1 %v243_v8 }
   0xf   :  { %130 = vmatprep.subr.bf16.mxu0 %v249_v0  ;;  %224 = vmatprep.subr.bf16.mxu1 %v249_v0 }
  0x12   :  { %131 = vmatpush1.bf16.msra.mxu0 %v244_v11  ;;  %233 = vmatpush1.bf16.msra.mxu1 %v244_v11 }
  0x13   :  { %132 = vmatprep.subr.bf16.mxu0 %v249_v0  ;;  %225 = vmatprep.subr.bf16.mxu1 %v249_v0 }
  0x16   :  { %133 = vmatpush1.bf16.msra.mxu0 %v245_v12  ;;  %234 = vmatpush1.bf16.msra.mxu1 %v245_v12 }
  0x17   :  { %134 = vmatprep.subr.bf16.mxu0 %v249_v0  ;;  %226 = vmatprep.subr.bf16.mxu1 %v249_v0 }
  0x1a   :  { %135 = vmatpush1.bf16.msra.mxu0 %v246_v13  ;;  %235 = vmatpush1.bf16.msra.mxu1 %v246_v13 }
  0x1b   :  { %136 = vmatprep.subr.bf16.mxu0 %v249_v0  ;;  %227 = vmatprep.subr.bf16.mxu1 %v249_v0 }
  0x1e   :  { %137 = vmatpush1.bf16.msra.mxu0 %v247_v16  ;;  %236 = vmatpush1.bf16.msra.mxu1 %v247_v16 }
  0x1f   :  { %152 = vmatprep.subr.bf16.mxu0 %v249_v0  ;;  %228 = vmatprep.subr.bf16.mxu1 %v249_v0 }
  0x22   :  { %153 = vmatpush2.bf16.msra.mxu0 %v120_v20  ;;  %237 = vmatpush2.bf16.msra.mxu1 %v120_v20 }
  0x25   :  { %155 = vmatmul.mubr.bf16.vlgmr.msra.gmra.mxu0 %v29_v24  ;;  %163 = vmatmul.mubr.bf16.vlgmr.msra.gmra.mxu1 %v31_v25 }
  0xe5   :  { %v156_v27 = vpop.f32.mrf.mxu0  ;;  %v164_v29 = vpop.f32.mrf.mxu1 }
  0xe6   :  { %v157_v30 = vadd.f32 %v206_v26, %v156_v27  ;;  %v165_v31 = vadd.f32 %v206_v26, %v164_v29 }
  0xe7   :  { %v158_v33 = vpop.f32.mrf.mxu0  ;;  %v166_v34 = vpop.f32.mrf.mxu1 }
  0xe8   :  { %v178_v35 = vmul.f32 %v218_v28, %v157_v30  ;;  %v180_v36 = vmul.f32 %v218_v28, %v165_v31 }
  0xe9   :  { %v159_v37 = vpop.f32.mrf.mxu0  ;;  %v167_v38 = vpop.f32.mrf.mxu1 }
  0xea   :  { %v189_v39 = vadd.f32 %v219_v32, %v178_v35  ;;  %v191_v40 = vadd.f32 %v219_v32, %v180_v36  ;;  %v160_v41 = vadd.f32 %v206_v26, %v159_v37  ;;  %v168_v42 = vadd.f32 %v206_v26, %v167_v38 }
  0xeb   :  { %v161_v43 = vpop.f32.mrf.mxu0  ;;  %v169_v44 = vpop.f32.mrf.mxu1 }
  0xec   :  { %v193_v45 = vmax.f32 %v189_v39, 0.0  ;;  %v195_v46 = vmax.f32 %v191_v40, 0.0  ;;  %v179_v47 = vmul.f32 %v218_v28, %v160_v41  ;;  %v181_v48 = vmul.f32 %v218_v28, %v168_v42 }
  0xee   :  { %198 = vst.msk [vmem:[%s358_s5] sm:$0xff] %vm197_vm3, %v193_v45  ;;  %200 = vst.msk [vmem:[%s358_s5 + $0x10] sm:$0xff] %vm197_vm3, %v195_v46  ;;  %v190_v49 = vadd.f32 %v219_v32, %v179_v47  ;;  %v192_v50 = vadd.f32 %v219_v32, %v181_v48 }
  0xf0   :  { %v194_v51 = vmax.f32 %v190_v49, 0.0  ;;  %v196_v52 = vmax.f32 %v192_v50, 0.0 }
  0xf2   :  { %199 = vst.msk [vmem:[%s358_s5 + $0x8] sm:$0xff] %vm197_vm3, %v194_v51  ;;  %201 = vst.msk [vmem:[%s358_s5 + $0x18] sm:$0xff] %vm197_vm3, %v196_v52 }

// kernel: forward.11
= control target key start
LH: loop header
LB: loop body
LE: loop exit
PB: predicated region body
PF: predicated region fallthrough
CT: control target
= control target key end

     0   :  { %s1368_s18 = smov 0   ;;  %s1370_s19 = smov 0   ;;  %s1962_s0 = inlined_call_operand.vmem [shape: f32[2,16,16], index: 0, kind: input, shape index: {}, may-alias: {0,1}]   ;;  %s1963_s1 = inlined_call_operand.vmem [shape: f32[2,16,16], index: 1, kind: input, shape index: {}, may-alias: {0,1}]   ;;  %s1964_s2 = inlined_call_operand.vmem [shape: f32[16,16,16], index: 2, kind: input, shape index: {}]   ;;  %s1965_s3 = inlined_call_operand.vmem [shape: f32[16,16,16], index: 3, kind: input, shape index: {}]   ;;  %s1966_s4 = inlined_call_operand.vmem [shape: f32[2,16,16], index: 4, kind: input, shape index: {}]   ;;  %s1967_s5 = inlined_call_operand.vmem [shape: f32[2,16,16], index: 5, kind: output, shape index: {}]  }
   0x1   :  { %s1372_s20 = smov 0  }
   0x2 LB: > { %s34_s21 = sadd.s32 1, %s1331_s19  ;;  %p1272_p0 = scmp.ge.s32.totalorder %s1335_s20, 1  ;;  %s1335_s20 = sphi %s1372_s20, %s15_s20   ;;  %s1331_s19 = sphi %s1370_s19, %s1973_s19   ;;  %s1327_s18 = sphi %s1368_s18, %s1972_s18  }
   0x3   : > { %p36_p1 = scmp.ge.s32.totalorder %s34_s21, 2  ;;  %p278_p2 = scmp.lt.s32.totalorder %s1335_s20, 3 }
   0x5   : > { %s1975_s21 = smov (%p36_p1, %s34_s21), 0  ;;  %p279_p3 = pnand %p1272_p0, %p278_p2 }
   0x6   : > { %p348_p4 = scmp.lt.s32.totalorder (!%p279_p3), %s1327_s18, 1 }
   0x7   : > { %282 = sbr.rel (%p279_p3) target bundleno = 209 (0xd1), region = 40 }
   0xc   : > { %v473_v0 = vlaneseq  ;;  %v1337_v1 = vmov 1966171168   ;;  %s1977_s18 = smov (!%p348_p4, %s1327_s18), 1  ;;  %vm1006_vm2 = vcmask 130048   ;;  %v1279_v7 = vld [vmem:[%s1966_s4 + $0x10] sm:$0xff] }
   0xd   : > { %v670_v2 = vunpack.c.l.s4 %v1337_v1  ;;  %s1390_s22 = sshll.u32 %s1977_s18, 4 }
   0xe   : > { %v1386_v3 = vshrl.u32 %v473_v0, 7  ;;  %v1388_v4 = vand.u32 127, %v473_v0  ;;  %s1409_s25 = scalar_lea.vmem %s1962_s0, %s1390_s22  ;;  %s1415_s28 = scalar_lea.vmem %s1963_s1, %s1390_s22 }
   0xf   : > { %v671_v5 = vunpack.c.0.s8 %v670_v2  ;;  %v404_v10 = vld [vmem:[%s1409_s25] sm:$0xff]  ;;  %v407_v43 = vld [vmem:[%s1415_s28 + $0x8] sm:$0xff]  ;;  %s402_s16 = scalar_lea.vmem %s1967_s5, %s1390_s22 }
  0x10   : > { %v1393_v6 = vadd.s32 8, %v1386_v3  ;;  %vm1397_vm0 = vcmp.le.s32.totalorder %v1386_v3, %v1388_v4  ;;  %v503_v8 = vsub.s32 1, %v1386_v3  ;;  %v1403_v9 = vsub.s32 0, %v1386_v3  ;;  %v406_v16 = vld [vmem:[%s1415_s28] sm:$0xff]  ;;  %v405_v57 = vld [vmem:[%s1409_s25 + $0x8] sm:$0xff] }
  0x11   : > { %v1428_v14 = vsub.s32 %v671_v5, %v1386_v3  ;;  %v514_v15 = vsub.s32 2, %v1386_v3  ;;  %v668_v18 = vcombine.high %v406_v16, %v406_v16  ;;  %v525_v20 = vsub.s32 3, %v1386_v3 }
  0x12   : > { %vm1420_vm1 = vcmp.le.s32.totalorder %v1393_v6, %v1388_v4  ;;  %v504_v12 = vrot.slane %v404_v10, %v503_v8  ;;  %v493_v13 = vrot.slane %v404_v10, %v1403_v9  ;;  %v536_v30 = vsub.s32 4, %v1386_v3 }
  0x13   : > { %v675_v17 = vrot.slane %v406_v16, %v1428_v14  ;;  %v515_v19 = vrot.slane %v404_v10, %v514_v15  ;;  %v682_v23 = vrot.slane %v668_v18, %v1428_v14  ;;  %v526_v28 = vrot.slane %v404_v10, %v525_v20 }
  0x14   : > { %506 = vbcast.lane.b32.xlu1 %v504_v12, 256  ;;  %495 = vbcast.lane.b32.xlu0 %v493_v13, 256  ;;  %v537_v40 = vrot.slane %v404_v10, %v536_v30  ;;  %v547_v41 = vsub.s32 5, %v1386_v3  ;;  %v724_v45 = vrot.slane %v407_v43, %v1428_v14  ;;  %v558_v47 = vsub.s32 6, %v1386_v3 }
  0x15   : > { %v683_v21 = vcombine.high %v675_v17, %v675_v17  ;;  %v691_v22 = vrot.slane %v675_v17, %v1428_v14  ;;  %v698_v27 = vrot.slane %v682_v23, %v1428_v14  ;;  %v684_v29 = vcombine.high %v682_v23, %v682_v23  ;;  %v408_v23 = vld [vmem:[%s1964_s2] sm:$0xff] }
  0x16   : > { %v548_v46 = vrot.slane %v404_v10, %v547_v41  ;;  %v740_v48 = vrot.slane %v724_v45, %v1428_v14  ;;  %v732_v50 = vcombine.high %v724_v45, %v724_v45  ;;  %v559_v51 = vrot.slane %v404_v10, %v558_v47 }
  0x17   : > { %v705_v24 = vrot.slane %v683_v21, %v1428_v14  ;;  %v1440_v25 = vrot.slane %v691_v22, %v1403_v9  ;;  %v713_v26 = vcombine.high %v691_v22, %v691_v22  ;;  %v1453_v34 = vrot.slane %v698_v27, %v1403_v9  ;;  %v410_v22 = vld [vmem:[%s1964_s2 + $0x10] sm:$0xff] }
  0x18   : > { %510 = vbcast.lane.b32.xlu1 %v504_v12, 264  ;;  %499 = vbcast.lane.b32.xlu0 %v493_v13, 264  ;;  %v712_v35 = vrot.slane %v684_v29, %v1428_v14  ;;  %v714_v36 = vcombine.high %v698_v27, %v698_v27  ;;  %v1474_v49 = vrot.slane %v740_v48, %v1403_v9  ;;  %v569_v52 = vsub.s32 7, %v1386_v3 }
  0x19   : > { %v1447_v31 = vrot.slane %v705_v24, %v1403_v9  ;;  %v1450_v32 = vrot.slane %v713_v26, %v1403_v9  ;;  %v715_v33 = vcombine.high %v705_v24, %v705_v24  ;;  %v754_v53 = vrot.slane %v732_v50, %v1428_v14  ;;  %v440_v24 = vld [vmem:[%s1965_s3] sm:$0xff]  ;;  %v441_v50 = vld [vmem:[%s1965_s3 + $0x8] sm:$0xff] }
  0x1a   : > { %v1460_v38 = vrot.slane %v712_v35, %v1403_v9  ;;  %v1463_v39 = vrot.slane %v714_v36, %v1403_v9  ;;  %v716_v42 = vcombine.high %v712_v35, %v712_v35  ;;  %v570_v55 = vrot.slane %v404_v10, %v569_v52 }
  0x1b   : > { %v1457_v37 = vrot.slane %v715_v33, %v1403_v9  ;;  %v1479_v54 = vrot.slane %v754_v53, %v1403_v9  ;;  %v762_v56 = vcombine.high %v740_v48, %v740_v48  ;;  %v581_v59 = vrot.slane %v405_v57, %v1403_v9  ;;  %v409_v48 = vld [vmem:[%s1964_s2 + $0x8] sm:$0xff] }
  0x1c   : > { %521 = vbcast.lane.b32.xlu1 %v515_v19, 264  ;;  %517 = vbcast.lane.b32.xlu0 %v515_v19, 256  ;;  %v1468_v44 = vrot.slane %v716_v42, %v1403_v9  ;;  %v764_v60 = vcombine.high %v754_v53, %v754_v53  ;;  %v717_v61 = vcombine.high %v407_v43, %v407_v43  ;;  %v411_v42 = vld [vmem:[%s1964_s2 + $0x18] sm:$0xff] }
  0x1d   : > { %v1483_v58 = vrot.slane %v762_v56, %v1403_v9  ;;  %v592_v0 = vrot.slane %v405_v57, %v503_v8  ;;  %v603_v10 = vrot.slane %v405_v57, %v514_v15  ;;  %v614_v8 = vrot.slane %v405_v57, %v525_v20  ;;  %v443_v43 = vld [vmem:[%s1965_s3 + $0x18] sm:$0xff] }
  0x1e   : > { %v1487_v62 = vrot.slane %v764_v60, %v1403_v9  ;;  %v731_v63 = vrot.slane %v717_v61, %v1428_v14  ;;  %v625_v18 = vrot.slane %v405_v57, %v536_v30  ;;  %v647_v21 = vrot.slane %v405_v57, %v558_v47 }
  0x1f   : > { %v658_v20 = vrot.slane %v405_v57, %v569_v52 }
  0x20   : > { %532 = vbcast.lane.b32.xlu1 %v526_v28, 264  ;;  %528 = vbcast.lane.b32.xlu0 %v526_v28, 256  ;;  %v747_v1 = vrot.slane %v731_v63, %v1428_v14  ;;  %v733_v5 = vcombine.high %v731_v63, %v731_v63 }
  0x22   : > { %v1494_v2 = vrot.slane %v747_v1, %v1403_v9  ;;  %v761_v12 = vrot.slane %v733_v5, %v1428_v14  ;;  %v763_v16 = vcombine.high %v747_v1, %v747_v1  ;;  %v636_v14 = vrot.slane %v405_v57, %v547_v41  ;;  %v445_v5 = vld [vmem:[%s1965_s3 + $0x28] sm:$0xff] }
  0x24   : > { %543 = vbcast.lane.b32.xlu1 %v537_v40, 264  ;;  %539 = vbcast.lane.b32.xlu0 %v537_v40, 256  ;;  %v1500_v13 = vrot.slane %v761_v12, %v1403_v9  ;;  %v1505_v17 = vrot.slane %v763_v16, %v1403_v9  ;;  %v765_v19 = vcombine.high %v761_v12, %v761_v12 }
  0x26   : > { %v1508_v15 = vrot.slane %v765_v19, %v1403_v9  ;;  %v442_v9 = vld [vmem:[%s1965_s3 + $0x10] sm:$0xff] }
  0x28   : > { %554 = vbcast.lane.b32.xlu1 %v548_v46, 264  ;;  %550 = vbcast.lane.b32.xlu0 %v548_v46, 256 }
  0x2c   : > { %565 = vbcast.lane.b32.xlu1 %v559_v51, 264  ;;  %561 = vbcast.lane.b32.xlu0 %v559_v51, 256 }
  0x30   : > { %576 = vbcast.lane.b32.xlu1 %v570_v55, 264  ;;  %572 = vbcast.lane.b32.xlu0 %v570_v55, 256 }
  0x34   : > { %587 = vbcast.lane.b32.xlu1 %v581_v59, 264  ;;  %583 = vbcast.lane.b32.xlu0 %v581_v59, 256 }
  0x38   : > { %598 = vbcast.lane.b32.xlu1 %v592_v0, 264  ;;  %594 = vbcast.lane.b32.xlu0 %v592_v0, 256 }
  0x3c   : > { %609 = vbcast.lane.b32.xlu1 %v603_v10, 264  ;;  %605 = vbcast.lane.b32.xlu0 %v603_v10, 256 }
  0x40   : > { %620 = vbcast.lane.b32.xlu1 %v614_v8, 264  ;;  %616 = vbcast.lane.b32.xlu0 %v614_v8, 256  ;;  %v444_v8 = vld [vmem:[%s1965_s3 + $0x20] sm:$0xff] }
  0x44   : > { %631 = vbcast.lane.b32.xlu1 %v625_v18, 264  ;;  %627 = vbcast.lane.b32.xlu0 %v625_v18, 256 }
  0x48   : > { %642 = vbcast.lane.b32.xlu1 %v636_v14, 264  ;;  %638 = vbcast.lane.b32.xlu0 %v636_v14, 256 }
  0x4c   : > { %653 = vbcast.lane.b32.xlu1 %v647_v21, 264  ;;  %649 = vbcast.lane.b32.xlu0 %v647_v21, 256 }
  0x50   : > { %664 = vbcast.lane.b32.xlu1 %v658_v20, 264  ;;  %660 = vbcast.lane.b32.xlu0 %v658_v20, 256 }
  0x86   : > { %v507_v26 = vpop.permute.xlu1 %506  ;;  %v496_v27 = vpop.permute.xlu0 %495 }
  0x87   : > { %v848_v28 = vsel %vm1397_vm0, %v507_v26, %v1447_v31  ;;  %v880_v29 = vsel %vm1397_vm0, %v1447_v31, %v507_v26  ;;  %v846_v30 = vsel %vm1397_vm0, %v496_v27, %v1440_v25  ;;  %v878_v33 = vsel %vm1397_vm0, %v1440_v25, %v496_v27 }
  0x88   : > { %v912_v35 = vmul.f32 %v848_v28, %v410_v22  ;;  %v944_v36 = vmul.f32 %v880_v29, %v442_v9  ;;  %v910_v40 = vmul.f32 %v846_v30, %v408_v23  ;;  %v942_v41 = vmul.f32 %v878_v33, %v440_v24  ;;  %v415_v28 = vld [vmem:[%s1964_s2 + $0x38] sm:$0xff] }
  0x89   : > { %v447_v29 = vld [vmem:[%s1965_s3 + $0x38] sm:$0xff] }
  0x8a   : > { %v976_v45 = vadd.f32 %v944_v36, %v912_v35  ;;  %v974_v46 = vadd.f32 %v942_v41, %v910_v40  ;;  %v511_v47 = vpop.permute.xlu1 %510  ;;  %v500_v51 = vpop.permute.xlu0 %499  ;;  %v414_v36 = vld [vmem:[%s1964_s2 + $0x30] sm:$0xff] }
  0x8b   : > { %v849_v52 = vsel %vm1420_vm1, %v511_v47, %v1447_v31  ;;  %v881_v53 = vsel %vm1420_vm1, %v1447_v31, %v511_v47  ;;  %v847_v55 = vsel %vm1420_vm1, %v500_v51, %v1440_v25  ;;  %v879_v56 = vsel %vm1420_vm1, %v1440_v25, %v500_v51  ;;  %v413_v31 = vld [vmem:[%s1964_s2 + $0x28] sm:$0xff]  ;;  %v412_v25 = vld [vmem:[%s1964_s2 + $0x20] sm:$0xff] }
  0x8c   : > { %v1008_v57 = vsel %vm1006_vm2, %v976_v45, 0.0  ;;  %v1007_v59 = vsel %vm1006_vm2, %v974_v46, 0.0  ;;  %v913_v60 = vmul.f32 %v849_v52, %v411_v42  ;;  %v945_v61 = vmul.f32 %v881_v53, %v443_v43 }
  0x8d   : > { %v1009_v63 = vadd.f32 %v1008_v57, %v1007_v59  ;;  %v911_v0 = vmul.f32 %v847_v55, %v409_v48  ;;  %v943_v1 = vmul.f32 %v879_v56, %v441_v50  ;;  %v417_v56 = vld [vmem:[%s1964_s2 + $0x48] sm:$0xff] }
  0x8e   : > { %v977_v10 = vadd.f32 %v945_v61, %v913_v60  ;;  %v522_v12 = vpop.permute.xlu1 %521  ;;  %v518_v16 = vpop.permute.xlu0 %517  ;;  %v449_v57 = vld [vmem:[%s1965_s3 + $0x48] sm:$0xff] }
  0x8f   : > { %v975_v18 = vadd.f32 %v943_v1, %v911_v0  ;;  %v851_v19 = vsel %vm1420_vm1, %v522_v12, %v1450_v32  ;;  %v883_v14 = vsel %vm1420_vm1, %v1450_v32, %v522_v12  ;;  %v850_v21 = vsel %vm1397_vm0, %v518_v16, %v1450_v32  ;;  %v448_v0 = vld [vmem:[%s1965_s3 + $0x40] sm:$0xff] }
  0x90   : > { %v1039_v20 = vsel %vm1006_vm2, %v977_v10, 0.0  ;;  %v915_v22 = vmul.f32 %v851_v19, %v413_v31  ;;  %v947_v9 = vmul.f32 %v883_v14, %v445_v5  ;;  %v882_v23 = vsel %vm1397_vm0, %v1450_v32, %v518_v16  ;;  %v446_v32 = vld [vmem:[%s1965_s3 + $0x30] sm:$0xff] }
  0x91   : > { %v1038_v24 = vsel %vm1006_vm2, %v975_v18, 0.0  ;;  %v914_v26 = vmul.f32 %v850_v21, %v412_v25  ;;  %v946_v27 = vmul.f32 %v882_v23, %v444_v8 }
  0x92   : > { %v1040_v30 = vadd.f32 %v1039_v20, %v1038_v24  ;;  %v979_v33 = vadd.f32 %v947_v9, %v915_v22  ;;  %v533_v35 = vpop.permute.xlu1 %532  ;;  %v529_v40 = vpop.permute.xlu0 %528  ;;  %v419_v20 = vld [vmem:[%s1964_s2 + $0x58] sm:$0xff] }
  0x93   : > { %v978_v41 = vadd.f32 %v946_v27, %v914_v26  ;;  %v853_v42 = vsel %vm1420_vm1, %v533_v35, %v1457_v37  ;;  %v885_v43 = vsel %vm1420_vm1, %v1457_v37, %v533_v35  ;;  %v852_v45 = vsel %vm1397_vm0, %v529_v40, %v1457_v37  ;;  %v451_v22 = vld [vmem:[%s1965_s3 + $0x58] sm:$0xff]  ;;  %v450_v26 = vld [vmem:[%s1965_s3 + $0x50] sm:$0xff] }
  0x94   : > { %v1041_v46 = vsel %vm1006_vm2, %v979_v33, 0.0  ;;  %v917_v47 = vmul.f32 %v853_v42, %v415_v28  ;;  %v949_v48 = vmul.f32 %v885_v43, %v447_v29  ;;  %v884_v50 = vsel %vm1397_vm0, %v1457_v37, %v529_v40  ;;  %v416_v37 = vld [vmem:[%s1964_s2 + $0x40] sm:$0xff] }
  0x95   : > { %v1042_v51 = vadd.f32 %v1041_v46, %v1040_v30  ;;  %v1010_v52 = vsel %vm1006_vm2, %v978_v41, 0.0  ;;  %v916_v53 = vmul.f32 %v852_v45, %v414_v36  ;;  %v948_v55 = vmul.f32 %v884_v50, %v446_v32  ;;  %v421_v46 = vld [vmem:[%s1964_s2 + $0x68] sm:$0xff] }
  0x96   : > { %v1011_v59 = vadd.f32 %v1010_v52, %v1009_v63  ;;  %v981_v60 = vadd.f32 %v949_v48, %v917_v47  ;;  %v544_v61 = vpop.permute.xlu1 %543  ;;  %v540_v1 = vpop.permute.xlu0 %539  ;;  %v453_v47 = vld [vmem:[%s1965_s3 + $0x68] sm:$0xff]  ;;  %v452_v52 = vld [vmem:[%s1965_s3 + $0x60] sm:$0xff] }
  0x97   : > { %v980_v31 = vadd.f32 %v948_v55, %v916_v53  ;;  %v855_v5 = vsel %vm1420_vm1, %v544_v61, %v1453_v34  ;;  %v887_v63 = vsel %vm1420_vm1, %v1453_v34, %v544_v61  ;;  %v854_v10 = vsel %vm1397_vm0, %v540_v1, %v1453_v34 }
  0x98   : > { %v1043_v12 = vsel %vm1006_vm2, %v981_v60, 0.0  ;;  %v919_v25 = vmul.f32 %v855_v5, %v417_v56  ;;  %v951_v8 = vmul.f32 %v887_v63, %v449_v57  ;;  %v886_v16 = vsel %vm1397_vm0, %v1453_v34, %v540_v1  ;;  %v418_v34 = vld [vmem:[%s1964_s2 + $0x50] sm:$0xff] }
  0x99   : > { %v1044_v18 = vadd.f32 %v1043_v12, %v1042_v51  ;;  %v1012_v19 = vsel %vm1006_vm2, %v980_v31, 0.0  ;;  %v918_v14 = vmul.f32 %v854_v10, %v416_v37  ;;  %v950_v21 = vmul.f32 %v886_v16, %v448_v0  ;;  %v423_v10 = vld [vmem:[%s1964_s2 + $0x78] sm:$0xff] }
  0x9a   : > { %v1013_v9 = vadd.f32 %v1012_v19, %v1011_v59  ;;  %v983_v23 = vadd.f32 %v951_v8, %v919_v25  ;;  %v555_v24 = vpop.permute.xlu1 %554  ;;  %v551_v27 = vpop.permute.xlu0 %550  ;;  %v455_v12 = vld [vmem:[%s1965_s3 + $0x78] sm:$0xff] }
  0x9b   : > { %v982_v28 = vadd.f32 %v950_v21, %v918_v14  ;;  %v857_v29 = vsel %vm1420_vm1, %v555_v24, %v1460_v38  ;;  %v889_v30 = vsel %vm1420_vm1, %v1460_v38, %v555_v24  ;;  %v856_v33 = vsel %vm1397_vm0, %v551_v27, %v1460_v38 }
  0x9c   : > { %v1045_v35 = vsel %vm1006_vm2, %v983_v23, 0.0  ;;  %v921_v36 = vmul.f32 %v857_v29, %v419_v20  ;;  %v953_v32 = vmul.f32 %v889_v30, %v451_v22  ;;  %v888_v40 = vsel %vm1397_vm0, %v1460_v38, %v551_v27  ;;  %v420_v38 = vld [vmem:[%s1964_s2 + $0x60] sm:$0xff]  ;;  %v425_v30 = vld [vmem:[%s1964_s2 + $0x88] sm:$0xff] }
  0x9d   : > { %v1046_v41 = vadd.f32 %v1045_v35, %v1044_v18  ;;  %v1014_v42 = vsel %vm1006_vm2, %v982_v28, 0.0  ;;  %v920_v43 = vmul.f32 %v856_v33, %v418_v34  ;;  %v952_v45 = vmul.f32 %v888_v40, %v450_v26  ;;  %v454_v18 = vld [vmem:[%s1965_s3 + $0x70] sm:$0xff]  ;;  %v457_v33 = vld [vmem:[%s1965_s3 + $0x88] sm:$0xff]  ;;  %v456_v40 = vld [vmem:[%s1965_s3 + $0x80] sm:$0xff] }
  0x9e   : > { %v1015_v48 = vadd.f32 %v1014_v42, %v1013_v9  ;;  %v985_v50 = vadd.f32 %v953_v32, %v921_v36  ;;  %v566_v51 = vpop.permute.xlu1 %565  ;;  %v562_v53 = vpop.permute.xlu0 %561 }
  0x9f   : > { %v984_v55 = vadd.f32 %v952_v45, %v920_v43  ;;  %v859_v56 = vsel %vm1420_vm1, %v566_v51, %v1463_v39  ;;  %v891_v57 = vsel %vm1420_vm1, %v1463_v39, %v566_v51  ;;  %v858_v59 = vsel %vm1397_vm0, %v562_v53, %v1463_v39 }
  0xa0   : > { %v1047_v60 = vsel %vm1006_vm2, %v985_v50, 0.0  ;;  %v923_v61 = vmul.f32 %v859_v56, %v421_v46  ;;  %v955_v37 = vmul.f32 %v891_v57, %v453_v47  ;;  %v890_v0 = vsel %vm1397_vm0, %v1463_v39, %v562_v53  ;;  %v422_v39 = vld [vmem:[%s1964_s2 + $0x70] sm:$0xff]  ;;  %v427_v56 = vld [vmem:[%s1964_s2 + $0x98] sm:$0xff] }
  0xa1   : > { %v1048_v1 = vadd.f32 %v1047_v60, %v1046_v41  ;;  %v1016_v31 = vsel %vm1006_vm2, %v984_v55, 0.0  ;;  %v922_v5 = vmul.f32 %v858_v59, %v420_v38  ;;  %v954_v63 = vmul.f32 %v890_v0, %v452_v52  ;;  %v459_v57 = vld [vmem:[%s1965_s3 + $0x98] sm:$0xff] }
  0xa2   : > { %v1017_v25 = vadd.f32 %v1016_v31, %v1015_v48  ;;  %v987_v8 = vadd.f32 %v955_v37, %v923_v61  ;;  %v577_v16 = vpop.permute.xlu1 %576  ;;  %v573_v19 = vpop.permute.xlu0 %572  ;;  %v458_v37 = vld [vmem:[%s1965_s3 + $0x90] sm:$0xff] }
  0xa3   : > { %v986_v14 = vadd.f32 %v954_v63, %v922_v5  ;;  %v861_v21 = vsel %vm1420_vm1, %v577_v16, %v1468_v44  ;;  %v893_v20 = vsel %vm1420_vm1, %v1468_v44, %v577_v16  ;;  %v860_v22 = vsel %vm1397_vm0, %v573_v19, %v1468_v44 }
  0xa4   : > { %v1049_v9 = vsel %vm1006_vm2, %v987_v8, 0.0  ;;  %v925_v23 = vmul.f32 %v861_v21, %v423_v10  ;;  %v957_v24 = vmul.f32 %v893_v20, %v455_v12  ;;  %v892_v34 = vsel %vm1397_vm0, %v1468_v44, %v573_v19  ;;  %v424_v44 = vld [vmem:[%s1964_s2 + $0x80] sm:$0xff]  ;;  %v461_v21 = vld [vmem:[%s1965_s3 + $0xa8] sm:$0xff] }
  0xa5   : > { %v1050_v26 = vadd.f32 %v1049_v9, %v1048_v1  ;;  %v1018_v27 = vsel %vm1006_vm2, %v986_v14, 0.0  ;;  %v924_v28 = vmul.f32 %v860_v22, %v422_v39  ;;  %v956_v29 = vmul.f32 %v892_v34, %v454_v18  ;;  %v429_v14 = vld [vmem:[%s1964_s2 + $0xa8] sm:$0xff] }
  0xa6   : > { %v1019_v35 = vadd.f32 %v1018_v27, %v1017_v25  ;;  %v989_v36 = vadd.f32 %v957_v24, %v925_v23  ;;  %v588_v32 = vpop.permute.xlu1 %587  ;;  %v584_v41 = vpop.permute.xlu0 %583  ;;  %v460_v23 = vld [vmem:[%s1965_s3 + $0xa0] sm:$0xff] }
  0xa7   : > { %v988_v42 = vadd.f32 %v956_v29, %v924_v28  ;;  %v863_v43 = vsel %vm1420_vm1, %v588_v32, %v1474_v49  ;;  %v895_v45 = vsel %vm1420_vm1, %v1474_v49, %v588_v32  ;;  %v862_v46 = vsel %vm1397_vm0, %v584_v41, %v1474_v49 }
  0xa8   : > { %v1051_v47 = vsel %vm1006_vm2, %v989_v36, 0.0  ;;  %v927_v48 = vmul.f32 %v863_v43, %v425_v30  ;;  %v959_v50 = vmul.f32 %v895_v45, %v457_v33  ;;  %v894_v51 = vsel %vm1397_vm0, %v1474_v49, %v584_v41  ;;  %v426_v49 = vld [vmem:[%s1964_s2 + $0x90] sm:$0xff]  ;;  %v431_v41 = vld [vmem:[%s1964_s2 + $0xb8] sm:$0xff] }
  0xa9   : > { %v1052_v38 = vadd.f32 %v1051_v47, %v1050_v26  ;;  %v1020_v52 = vsel %vm1006_vm2, %v988_v42, 0.0  ;;  %v926_v53 = vmul.f32 %v862_v46, %v424_v44  ;;  %v958_v55 = vmul.f32 %v894_v51, %v456_v40  ;;  %v463_v42 = vld [vmem:[%s1965_s3 + $0xb8] sm:$0xff]  ;;  %v462_v47 = vld [vmem:[%s1965_s3 + $0xb0] sm:$0xff] }
  0xaa   : > { %v1021_v59 = vadd.f32 %v1020_v52, %v1019_v35  ;;  %v991_v60 = vadd.f32 %v959_v50, %v927_v48  ;;  %v599_v61 = vpop.permute.xlu1 %598  ;;  %v595_v0 = vpop.permute.xlu0 %594  ;;  %v1807_v50 = vadd.s32 1, %v1393_v6 }
  0xab   : > { %v990_v1 = vadd.f32 %v958_v55, %v926_v53  ;;  %v865_v31 = vsel %vm1420_vm1, %v599_v61, %v1479_v54  ;;  %v897_v5 = vsel %vm1420_vm1, %v1479_v54, %v599_v61  ;;  %v864_v63 = vsel %vm1397_vm0, %v595_v0, %v1479_v54 }
  0xac   : > { %v1053_v10 = vsel %vm1006_vm2, %v991_v60, 0.0  ;;  %v929_v12 = vmul.f32 %v865_v31, %v427_v56  ;;  %v961_v25 = vmul.f32 %v897_v5, %v459_v57  ;;  %v896_v8 = vsel %vm1397_vm0, %v1479_v54, %v595_v0  ;;  %v428_v54 = vld [vmem:[%s1964_s2 + $0xa0] sm:$0xff]  ;;  %v465_v0 = vld [vmem:[%s1965_s3 + $0xc8] sm:$0xff] }
  0xad   : > { %v1054_v16 = vadd.f32 %v1053_v10, %v1052_v38  ;;  %v1022_v39 = vsel %vm1006_vm2, %v990_v1, 0.0  ;;  %v928_v18 = vmul.f32 %v864_v63, %v426_v49  ;;  %v960_v19 = vmul.f32 %v896_v8, %v458_v37  ;;  %v433_v37 = vld [vmem:[%s1964_s2 + $0xc8] sm:$0xff]  ;;  %v464_v63 = vld [vmem:[%s1965_s3 + $0xc0] sm:$0xff] }
  0xae   : > { %v1023_v20 = vadd.f32 %v1022_v39, %v1021_v59  ;;  %v993_v22 = vadd.f32 %v961_v25, %v929_v12  ;;  %v610_v9 = vpop.permute.xlu1 %609  ;;  %v606_v24 = vpop.permute.xlu0 %605  ;;  %v1074_v12 = vcvt.s32.f32 %v1807_v50  ;;  %v1837_v25 = vadd.s32 1, %v1386_v3 }
  0xaf   : > { %v992_v34 = vadd.f32 %v960_v19, %v928_v18  ;;  %v867_v26 = vsel %vm1420_vm1, %v610_v9, %v1483_v58  ;;  %v899_v27 = vsel %vm1420_vm1, %v1483_v58, %v610_v9  ;;  %v866_v28 = vsel %vm1397_vm0, %v606_v24, %v1483_v58 }
  0xb0   : > { %v1055_v29 = vsel %vm1006_vm2, %v993_v22, 0.0  ;;  %v931_v30 = vmul.f32 %v867_v26, %v429_v14  ;;  %v963_v33 = vmul.f32 %v899_v27, %v461_v21  ;;  %v898_v35 = vsel %vm1397_vm0, %v1483_v58, %v606_v24  ;;  %v430_v58 = vld [vmem:[%s1964_s2 + $0xb0] sm:$0xff]  ;;  %v467_v24 = vld [vmem:[%s1965_s3 + $0xd8] sm:$0xff] }
  0xb1   : > { %v1056_v36 = vadd.f32 %v1055_v29, %v1054_v16  ;;  %v1024_v32 = vsel %vm1006_vm2, %v992_v34, 0.0  ;;  %v930_v44 = vmul.f32 %v866_v28, %v428_v54  ;;  %v962_v40 = vmul.f32 %v898_v35, %v460_v23  ;;  %v435_v23 = vld [vmem:[%s1964_s2 + $0xd8] sm:$0xff]  ;;  %v466_v28 = vld [vmem:[%s1965_s3 + $0xd0] sm:$0xff] }
  0xb2   : > { %v1025_v43 = vadd.f32 %v1024_v32, %v1023_v20  ;;  %v995_v45 = vadd.f32 %v963_v33, %v931_v30  ;;  %v621_v46 = vpop.permute.xlu1 %620  ;;  %v617_v48 = vpop.permute.xlu0 %616  ;;  %v1084_v30 = vadd.s32 1, %v1388_v4  ;;  %v1073_v33 = vcvt.s32.f32 %v1837_v25 }
  0xb3   : > { %v994_v51 = vadd.f32 %v962_v40, %v930_v44  ;;  %v869_v38 = vsel %vm1420_vm1, %v621_v46, %v1487_v62  ;;  %v901_v52 = vsel %vm1420_vm1, %v1487_v62, %v621_v46  ;;  %v868_v53 = vsel %vm1397_vm0, %v617_v48, %v1487_v62 }
  0xb4   : > { %v1057_v55 = vsel %vm1006_vm2, %v995_v45, 0.0  ;;  %v933_v56 = vmul.f32 %v869_v38, %v431_v41  ;;  %v965_v57 = vmul.f32 %v901_v52, %v463_v42  ;;  %v900_v6 = vsel %vm1397_vm0, %v1487_v62, %v617_v48  ;;  %v432_v62 = vld [vmem:[%s1964_s2 + $0xc0] sm:$0xff]  ;;  %v469_v48 = vld [vmem:[%s1965_s3 + $0xe8] sm:$0xff] }
  0xb5   : > { %v1058_v59 = vadd.f32 %v1057_v55, %v1056_v36  ;;  %v1026_v60 = vsel %vm1006_vm2, %v994_v51, 0.0  ;;  %v932_v61 = vmul.f32 %v868_v53, %v430_v58  ;;  %v964_v49 = vmul.f32 %v900_v6, %v462_v47  ;;  %v437_v47 = vld [vmem:[%s1964_s2 + $0xe8] sm:$0xff]  ;;  %v468_v52 = vld [vmem:[%s1965_s3 + $0xe0] sm:$0xff] }
  0xb6   : > { %v1027_v1 = vadd.f32 %v1026_v60, %v1025_v43  ;;  %v997_v31 = vadd.f32 %v965_v57, %v933_v56  ;;  %v632_v5 = vpop.permute.xlu1 %631  ;;  %v628_v10 = vpop.permute.xlu0 %627  ;;  %v1076_v55 = vmul.f32 0.0625, %v1074_v12  ;;  %v1085_v56 = vcvt.s32.f32 %v1084_v30 }
  0xb7   : > { %v996_v8 = vadd.f32 %v964_v49, %v932_v61  ;;  %v871_v16 = vsel %vm1420_vm1, %v632_v5, %v1494_v2  ;;  %v903_v39 = vsel %vm1420_vm1, %v1494_v2, %v632_v5  ;;  %v870_v18 = vsel %vm1397_vm0, %v628_v10, %v1494_v2 }
  0xb8   : > { %v1059_v19 = vsel %vm1006_vm2, %v997_v31, 0.0  ;;  %v935_v14 = vmul.f32 %v871_v16, %v433_v37  ;;  %v967_v21 = vmul.f32 %v903_v39, %v465_v0  ;;  %v902_v3 = vsel %vm1397_vm0, %v1494_v2, %v628_v10  ;;  %v434_v2 = vld [vmem:[%s1964_s2 + $0xd0] sm:$0xff]  ;;  %v471_v10 = vld [vmem:[%s1965_s3 + $0xf8] sm:$0xff] }
  0xb9   : > { %v1060_v20 = vadd.f32 %v1059_v19, %v1058_v59  ;;  %v1028_v22 = vsel %vm1006_vm2, %v996_v8, 0.0  ;;  %v934_v9 = vmul.f32 %v870_v18, %v432_v62  ;;  %v966_v54 = vmul.f32 %v902_v3, %v464_v63  ;;  %v439_v63 = vld [vmem:[%s1964_s2 + $0xf8] sm:$0xff]  ;;  %v470_v39 = vld [vmem:[%s1965_s3 + $0xf0] sm:$0xff] }
  0xba   : > { %v1029_v34 = vadd.f32 %v1028_v22, %v1027_v1  ;;  %v999_v26 = vadd.f32 %v967_v21, %v935_v14  ;;  %v643_v27 = vpop.permute.xlu1 %642  ;;  %v639_v29 = vpop.permute.xlu0 %638  ;;  %v1086_v8 = vmul.f32 0.0625, %v1085_v56  ;;  %v1075_v18 = vmul.f32 0.0625, %v1073_v33 }
  0xbb   : > { %v998_v35 = vadd.f32 %v966_v54, %v934_v9  ;;  %v873_v36 = vsel %vm1420_vm1, %v643_v27, %v1500_v13  ;;  %v905_v32 = vsel %vm1420_vm1, %v1500_v13, %v643_v27  ;;  %v872_v44 = vsel %vm1397_vm0, %v639_v29, %v1500_v13  ;;  %v1070_v9 = vld [vmem:[%s1966_s4 + $0x8] sm:$0xff] }
  0xbc   : > { %v1061_v40 = vsel %vm1006_vm2, %v999_v26, 0.0  ;;  %v937_v41 = vmul.f32 %v873_v36, %v435_v23  ;;  %v969_v42 = vmul.f32 %v905_v32, %v467_v24  ;;  %v904_v4 = vsel %vm1397_vm0, %v1500_v13, %v639_v29  ;;  %v436_v13 = vld [vmem:[%s1964_s2 + $0xe0] sm:$0xff]  ;;  %v1280_v29 = vld [vmem:[%s1966_s4 + $0x18] sm:$0xff] }
  0xbd   : > { %v1062_v43 = vadd.f32 %v1061_v40, %v1060_v20  ;;  %v1030_v45 = vsel %vm1006_vm2, %v998_v35, 0.0  ;;  %v936_v46 = vmul.f32 %v872_v44, %v434_v2  ;;  %v968_v58 = vmul.f32 %v904_v4, %v466_v28  ;;  %v1069_v26 = vld [vmem:[%s1966_s4] sm:$0xff] }
  0xbe   : > { %v1031_v50 = vadd.f32 %v1030_v45, %v1029_v34  ;;  %v1001_v51 = vadd.f32 %v969_v42, %v937_v41  ;;  %v654_v38 = vpop.permute.xlu1 %653  ;;  %v650_v53 = vpop.permute.xlu0 %649  ;;  %v1078_v33 = vmul.f32 %v1076_v55, %v1070_v9  ;;  %v1077_v36 = vmul.f32 %v1075_v18, %v1069_v26 }
  0xbf   : > { %v1000_v57 = vadd.f32 %v968_v58, %v936_v46  ;;  %v875_v6 = vsel %vm1420_vm1, %v654_v38, %v1505_v17  ;;  %v907_v59 = vsel %vm1420_vm1, %v1505_v17, %v654_v38  ;;  %v874_v60 = vsel %vm1397_vm0, %v650_v53, %v1505_v17 }
  0xc0   : > { %v1063_v61 = vsel %vm1006_vm2, %v1001_v51, 0.0  ;;  %v939_v49 = vmul.f32 %v875_v6, %v437_v47  ;;  %v971_v37 = vmul.f32 %v907_v59, %v469_v48  ;;  %v906_v0 = vsel %vm1397_vm0, %v1505_v17, %v650_v53  ;;  %v438_v17 = vld [vmem:[%s1964_s2 + $0xf0] sm:$0xff] }
  0xc1   : > { %v1064_v1 = vadd.f32 %v1063_v61, %v1062_v43  ;;  %v1032_v31 = vsel %vm1006_vm2, %v1000_v57, 0.0  ;;  %v938_v5 = vmul.f32 %v874_v60, %v436_v13  ;;  %v970_v62 = vmul.f32 %v906_v0, %v468_v52 }
  0xc2   : > { %v1033_v12 = vadd.f32 %v1032_v31, %v1031_v50  ;;  %v1003_v25 = vadd.f32 %v971_v37, %v939_v49  ;;  %v665_v16 = vpop.permute.xlu1 %664  ;;  %v661_v19 = vpop.permute.xlu0 %660  ;;  %v1088_v32 = vmul.f32 %v1280_v29, %v1086_v8  ;;  %v1087_v41 = vmul.f32 %v1279_v7, %v1086_v8 }
  0xc3   : > { %v1002_v14 = vadd.f32 %v970_v62, %v938_v5  ;;  %v877_v21 = vsel %vm1420_vm1, %v665_v16, %v1508_v15  ;;  %v909_v3 = vsel %vm1420_vm1, %v1508_v15, %v665_v16  ;;  %v876_v20 = vsel %vm1397_vm0, %v661_v19, %v1508_v15 }
  0xc4   : > { %v1065_v22 = vsel %vm1006_vm2, %v1003_v25, 0.0  ;;  %v941_v54 = vmul.f32 %v877_v21, %v439_v63  ;;  %v973_v23 = vmul.f32 %v909_v3, %v471_v10  ;;  %v908_v24 = vsel %vm1397_vm0, %v1508_v15, %v661_v19 }
  0xc5   : > { %v1066_v34 = vadd.f32 %v1065_v22, %v1064_v1  ;;  %v1034_v11 = vsel %vm1006_vm2, %v1002_v14, 0.0  ;;  %v940_v27 = vmul.f32 %v876_v20, %v438_v17  ;;  %v972_v2 = vmul.f32 %v908_v24, %v470_v39 }
  0xc6   : > { %v1035_v28 = vadd.f32 %v1034_v11, %v1033_v12  ;;  %v1005_v30 = vadd.f32 %v973_v23, %v941_v54 }
  0xc7   : > { %v1004_v15 = vadd.f32 %v972_v2, %v940_v27 }
  0xc8   : > { %v1067_v35 = vsel %vm1006_vm2, %v1005_v30, 0.0 }
  0xc9   : > { %v1068_v44 = vadd.f32 %v1067_v35, %v1066_v34  ;;  %v1036_v40 = vsel %vm1006_vm2, %v1004_v15, 0.0 }
  0xca   : > { %v1037_v42 = vadd.f32 %v1036_v40, %v1035_v28 }
  0xcb   : > { %v1080_v4 = vadd.f32 %v1078_v33, %v1068_v44 }
  0xcc   : > { %v1079_v43 = vadd.f32 %v1077_v36, %v1037_v42 }
  0xcd   : > { %v1090_v45 = vadd.f32 %v1088_v32, %v1080_v4 }
  0xce   : > { %v1089_v46 = vadd.f32 %v1087_v41, %v1079_v43 }
  0xcf   : > { %1092 = vst.msk [vmem:[%s402_s16 + $0x8] sm:$0xff] %vm1006_vm2, %v1090_v45 }
  0xd0   : > { %1091 = vst.msk [vmem:[%s402_s16] sm:$0xff] %vm1006_vm2, %v1089_v46 }
  0xd1 PF: > { %s15_s20 = sadd.s32 1, %s1335_s20   ;;  %s1972_s18 = smov %s1331_s19 }
  0xd2   : > { %p12_p5 = scmp.ge.s32.totalorder %s15_s20, 4   ;;  %s1973_s19 = smov %s1975_s21 }
  0xd4   :  { %14 = sbr.rel (!%p12_p5) target bundleno = 2 (0x2), region = 83 }

// kernel: forward.8
= control target key start
LH: loop header
LB: loop body
LE: loop exit
PB: predicated region body
PF: predicated region fallthrough
CT: control target
= control target key end

     0   :  { %s3855_s25 = smov 0   ;;  %s4534_s0 = inlined_call_operand.vmem [shape: f32[2,16,16], index: 0, kind: input, shape index: {}]   ;;  %s4535_s1 = inlined_call_operand.vmem [shape: bf16[16,48], index: 1, kind: input, shape index: {}]   ;;  %s4536_s2 = inlined_call_operand.vmem [shape: f32[1,48], index: 2, kind: input, shape index: {}]   ;;  %s4537_s3 = inlined_call_operand.vmem [shape: f32[16,16], index: 3, kind: input, shape index: {}]   ;;  %s4538_s4 = inlined_call_operand.vmem [shape: f32[1,16], index: 4, kind: input, shape index: {}]   ;;  %s4539_s5 = inlined_call_operand.vmem [shape: bf16[16,2048], index: 5, kind: input, shape index: {}]   ;;  %s4540_s6 = inlined_call_operand.vmem [shape: f32[1,2048], index: 6, kind: input, shape index: {}]   ;;  %s4541_s7 = inlined_call_operand.vmem [shape: bf16[2048,16], index: 7, kind: input, shape index: {}]   ;;  %s4542_s8 = inlined_call_operand.vmem [shape: f32[1,16], index: 8, kind: input, shape index: {}]   ;;  %s4543_s9 = inlined_call_operand.vmem [shape: f32[1,16], index: 9, kind: input, shape index: {}]   ;;  %s4544_s10 = inlined_call_operand.vmem [shape: f32[1,16], index: 10, kind: input, shape index: {}]   ;;  %s4545_s11 = inlined_call_operand.vmem [shape: f32[1,16], index: 11, kind: input, shape index: {}]   ;;  %s4546_s12 = inlined_call_operand.vmem [shape: f32[1,16], index: 12, kind: input, shape index: {}]   ;;  %s4547_s13 = inlined_call_operand.vmem [shape: f32[2,16,16], index: 13, kind: output, shape index: {}]  }
   0x1 LB: > { %s3166_s26 = sadd.s32 4294967295, %s3775_s25   ;;  %p3170_p0 = scmp.ge.s32.totalorder %s3775_s25, 1  ;;  %s3775_s25 = sphi %s3855_s25, %s23_s25  }
   0x2   : > { %p387_p1 = scmp.lt.s32.totalorder %s3775_s25, 3 }
   0x4   : > { %p388_p2 = pnand %p3170_p0, %p387_p1 }
   0x5   : > { %p431_p3 = scmp.lt.s32.totalorder (!%p388_p2), %s3166_s26, 1  ;;  %s3779_s18 = smov (!%p388_p2), 104  }
   0x6   : > { %391 = sbr.rel (%p388_p2) target bundleno = 2431 (0x97f), region = 72  ;;  %s3780_s19 = smov (!%p388_p2), 112  }
   0x7   : > { %s3781_s20 = smov (!%p388_p2), 120   ;;  %s3782_s21 = smov (!%p388_p2), 96  }
   0x8   : > { %s3783_s22 = smov (!%p388_p2), 88  }
   0xb   : > { %v3616_v0 = vld [vmem:[%s4535_s1] sm:$0xff]   ;;  %v3777_v1 = vmov 0.0   ;;  %vm3778_vm0 = vmmov 0   ;;  %s4549_s26 = smov (!%p431_p3, %s3166_s26), 1  ;;  %vm460_vm1 = vcmask 130048   ;;  %vm513_vm2 = vcmask 64512  }
   0xc   : > { %3556 = vmatprep.subr.bf16.mxu0 %v3777_v1  ;;  %3558 = vmatprep.mubr.msk.bf16.mxu0 %vm3778_vm0, %v3777_v1  ;;  %s3354_s29 = sshll.u32 %s4549_s26, 4  ;;  %v3175_v5 = vld [vmem:[%s4536_s2] ss:$0 sm:$0xff] }
   0xd   : > { %3557 = vmatpush3.bf16.msra.mxu0 %v3616_v0  ;;  %s435_s15 = scalar_lea.vmem %s4534_s0, %s3354_s29  ;;  %s440_s27 = scalar_lea.vmem %s4547_s13, %s3354_s29 }
   0xe   : > { %v3874_v2 = vld [vmem:[%s435_s15] sm:$0xff]  ;;  %v3876_v3 = vld [vmem:[%s435_s15 + $0x8] sm:$0xff] }
   0xf   : > { %v444_v4 = vpack.c.bf16 %v3876_v3, %v3874_v2 }
  0x11   : > { %3559 = vmatmul.mubr.msk.bf16.vlgmr.msra.gmra.mxu0 %vm460_vm1, %v444_v4  ;;  %v505_v4 = vld [vmem:[%s4537_s3] sm:$0xff] }
  0xd1   : > { %v498_v6 = vpop.f32.mrf.mxu0 }
  0xd2   : > { %v3884_v7 = vadd.f32 %v3175_v5, %v498_v6 }
  0xd3   : > { %v3560_v8 = vpop.f32.mrf.mxu0 }
  0xd4   : > { %3566 = vmatprep.mubr.msk.f32.mxu1 %vm513_vm2, %v3884_v7 }
  0xd5   : > { %v501_v9 = vpop.f32.mrf.mxu0 }
  0xd6   : > { %v3888_v10 = vadd.f32 %v3175_v5, %v501_v9  ;;  %v506_v5 = vld [vmem:[%s4537_s3 + $0x8] sm:$0xff] }
  0xd7   : > { %v3561_v11 = vpop.f32.mrf.mxu0 }
  0xd8   : > { %714 = vrot.lane.b32.xlu1 %v3888_v10, %s3779_s18  ;;  %511 = vrot.lane.b32.xlu0 %v3888_v10, %s3780_s19 }
  0xdc   : > { %712 = vrot.lane.b32.xlu1 %v3884_v7, %s3779_s18  ;;  %509 = vrot.lane.b32.xlu0 %v3884_v7, %s3780_s19 }
  0xe0   : > { %710 = vrot.lane.b32.xlu1 %v3888_v10, %s3781_s20  ;;  %708 = vrot.lane.b32.xlu0 %v3884_v7, %s3781_s20 }
 0x14a   : > { %v512_v12 = vpop.permute.xlu0 %511  ;;  %v715_v13 = vpop.permute.xlu1 %714 }
 0x14b   : > { %3562 = vmatprep.subr.msk.mxu1 %vm513_vm2, %v512_v12 }
 0x14c   : > { %3563 = vmatpush3.xpose.msk.msra.mxu1 %vm513_vm2, %v512_v12  ;;  %v3194_v12 = vld [vmem:[%s4538_s4] ss:$0 sm:$0xff] }
 0x14e   : > { %v510_v14 = vpop.permute.xlu0 %509  ;;  %v713_v16 = vpop.permute.xlu1 %712 }
 0x14f   : > { %3564 = vmatprep.subr.msk.mxu1 %vm513_vm2, %v510_v14 }
 0x150   : > { %3565 = vmatpush3.xpose.msk.msra.mxu1 %vm513_vm2, %v510_v14 }
 0x151   : > { %3576 = vmatprep.subr.msk.mxu1 %vm513_vm2, %v715_v13 }
 0x152   : > { %v709_v15 = vpop.permute.xlu0 %708  ;;  %v711_v17 = vpop.permute.xlu1 %710 }
 0x153   : > { %3567 = vmatmul.mubr.msk.f32.vlgmr.msra.gmra.mxu1 %vm513_vm2, %v3888_v10 }
 0x154   : > { %3577 = vmatpush3.xpose.msk.msra.mxu1 %vm513_vm2, %v715_v13  ;;  %3580 = vmatprep.mubr.msk.f32.mxu1 %vm513_vm2, %v709_v15 }
 0x155   : > { %3578 = vmatprep.subr.msk.mxu1 %vm513_vm2, %v713_v16 }
 0x158   : > { %3579 = vmatpush3.xpose.msk.msra.mxu1 %vm513_vm2, %v713_v16 }
 0x159   : > { %3595 = vmatprep.subr.mxu1 %v505_v4 }
 0x15b   : > { %3581 = vmatmul.mubr.msk.f32.vlgmr.msra.gmra.mxu1 %vm513_vm2, %v711_v17 }
 0x15c   : > { %3596 = vmatpush3.msra.mxu1 %v505_v4  ;;  %v1134_v4 = vld [vmem:[%s4539_s5 + $0x28] sm:$0xff] }
 0x213   : > { %v3568_v18 = vpop.f32.mrf.mxu1 }
 0x214   : > { %v598_v19 = vmul.f32 0.35355338, %v3568_v18 }
 0x215   : > { %v588_v20 = vpop.f32.mrf.mxu1 }
 0x216   : > { %v597_v21 = vmul.f32 0.35355338, %v588_v20  ;;  %v602_v22 = vsel %vm460_vm1, %v598_v19, -inf }
 0x217   : > { %603 = vmax.xlane.f32.xlu1 %v602_v22 }
 0x218   : > { %v599_v23 = vsel %vm460_vm1, %v597_v21, -inf }
 0x219   : > { %600 = vmax.xlane.f32.xlu0 %v599_v23 }
 0x21b   : > { %v3582_v24 = vpop.f32.mrf.mxu1 }
 0x21c   : > { %v800_v27 = vmul.f32 0.35355338, %v3582_v24 }
 0x21d   : > { %v790_v25 = vpop.f32.mrf.mxu1 }
 0x21e   : > { %v799_v26 = vmul.f32 0.35355338, %v790_v25  ;;  %v804_v29 = vsel %vm460_vm1, %v800_v27, -inf }
 0x220   : > { %v801_v28 = vsel %vm460_vm1, %v799_v26, -inf }
 0x221   : > { %802 = vmax.xlane.f32.xlu0 %v801_v28 }
 0x225   : > { %805 = vmax.xlane.f32.xlu0 %v804_v29 }
 0x228   : > { %623 = vrot.lane.b32.xlu1 %v3888_v10, %s3782_s21 }
 0x2a0   : > { %v604_v30 = vpop.xlane.xlu1 %603 }
 0x2a1   : > { %v606_v31 = vsub.f32 %v598_v19, %v604_v30 }
 0x2a2   : > { %v601_v32 = vpop.xlane.xlu0 %600 }
 0x2a3   : > { %v609_v33 = vmul.f32 1.442695, %v606_v31  ;;  %v605_v34 = vsub.f32 %v597_v21, %v601_v32  ;;  %v1137_v32 = vld [vmem:[%s4539_s5 + $0x40] sm:$0xff] }
 0x2a4   : > { %v624_v35 = vpop.permute.xlu1 %623 }
 0x2a5   : > { %3745 = vpow2.f32 %v609_v33  ;;  %v607_v36 = vmul.f32 1.442695, %v605_v34  ;;  %3569 = vmatprep.subr.mxu0 %v624_v35  ;;  %v1130_v33 = vld [vmem:[%s4539_s5 + $0x8] sm:$0xff] }
 0x2a6   : > { %3570 = vmatpush3.msra.mxu0 %v624_v35  ;;  %v1138_v35 = vld [vmem:[%s4539_s5 + $0x48] sm:$0xff] }
 0x2a7   : > { %3747 = vpow2.f32 %v607_v36 }
 0x2aa   : > { %v803_v37 = vpop.xlane.xlu0 %802 }
 0x2ab   : > { %v807_v47 = vsub.f32 %v799_v26, %v803_v37  ;;  %v3199_v37 = vcombine.low %v1130_v33, %v1138_v35 }
 0x2ad   : > { %v809_v48 = vmul.f32 1.442695, %v807_v47 }
 0x2ae   : > { %v806_v38 = vpop.xlane.xlu0 %805 }
 0x2af   : > { %v808_v39 = vsub.f32 %v800_v27, %v806_v38  ;;  %v3200_v38 = vcombine.high %v1130_v33, %v1138_v35  ;;  %v3633_v33 = vld [vmem:[%s4541_s7 + $0x58] sm:$0xff]  }
 0x2b0   : > { %v3635_v35 = vld [vmem:[%s4541_s7 + $0x18] sm:$0xff]  }
 0x2b1   : > { %v811_v40 = vmul.f32 1.442695, %v808_v39  ;;  %1369 = vmatprep.subr.bf16.mxu1 %v3200_v38  ;;  %v3784_v39 = vmov 0   ;;  %v3638_v38 = vld [vmem:[%s4541_s7 + $0xd0] sm:$0xff]  }
 0x2b2   : > { %v3746_v41 = vpop.eup %3745 }
 0x2b3   : > { %3749 = vpow2.f32 %v811_v40  ;;  %v614_v42 = vsel %vm460_vm1, %v3746_v41, 0.0  ;;  %v1131_v40 = vld [vmem:[%s4539_s5 + $0x10] sm:$0xff] }
 0x2b4   : > { %v3748_v43 = vpop.eup %3747  ;;  %615 = vadd.xlane.f32.xlu0 %v614_v42  ;;  %3751 = vpow2.f32 %v809_v48  ;;  %v1132_v42 = vld [vmem:[%s4539_s5 + $0x18] sm:$0xff] }
 0x2b5   : > { %v611_v44 = vsel %vm460_vm1, %v3748_v43, 0.0 }
 0x2b6   : > { %612 = vadd.xlane.f32.xlu1 %v611_v44 }
 0x2c0   : > { %v3750_v45 = vpop.eup %3749 }
 0x2c1   : > { %v816_v46 = vsel %vm460_vm1, %v3750_v45, 0.0  ;;  %v3752_v49 = vpop.eup %3751 }
 0x2c2   : > { %817 = vadd.xlane.f32.xlu0 %v816_v46  ;;  %v813_v50 = vsel %vm460_vm1, %v3752_v49, 0.0 }
 0x2c7   : > { %825 = vrot.lane.b32.xlu1 %v3888_v10, %s3783_s22 }
 0x2d8   : > { %621 = vrot.lane.b32.xlu0 %v3884_v7, %s3782_s21 }
 0x2eb   : > { %814 = vadd.xlane.f32.xlu1 %v813_v50 }
 0x2fc   : > { %823 = vrot.lane.b32.xlu1 %v3884_v7, %s3783_s22 }
 0x33d   : > { %v616_v51 = vpop.xlane.xlu0 %615 }
 0x33e   : > { %3753 = vrcp.f32 %v616_v51 }
 0x33f   : > { %v613_v52 = vpop.xlane.xlu1 %612 }
 0x340   : > { %3755 = vrcp.f32 %v613_v52 }
 0x343   : > { %v826_v59 = vpop.permute.xlu1 %825 }
 0x34b   : > { %v818_v53 = vpop.xlane.xlu0 %817  ;;  %v3754_v54 = vpop.eup %3753 }
 0x34c   : > { %v620_v58 = vmul.f32 %v3754_v54, %v3746_v41  ;;  %3757 = vrcp.f32 %v818_v53  ;;  %v1139_v41 = vld [vmem:[%s4539_s5 + $0x50] sm:$0xff] }
 0x34d   : > { %v3756_v55 = vpop.eup %3755  ;;  %v3202_v44 = vcombine.high %v1131_v40, %v1139_v41 }
 0x34e   : > { %v619_v56 = vmul.f32 %v3756_v55, %v3748_v43  ;;  %v3201_v43 = vcombine.low %v1131_v40, %v1139_v41  ;;  %v3640_v40 = vld [vmem:[%s4541_s7 + $0x90] sm:$0xff]   ;;  %v3641_v41 = vld [vmem:[%s4541_s7 + $0x48] sm:$0xff]  }
 0x34f   : > { %v622_v57 = vpop.permute.xlu0 %621 }
 0x350   : > { %3571 = vmatprep.subr.mxu0 %v622_v57  ;;  %3573 = vmatprep.mubr.msk.f32.mxu0 %vm460_vm1, %v619_v56  ;;  %v3195_v56 = vld [vmem:[%s4543_s9] ss:$0 sm:$0xff] }
 0x351   : > { %3572 = vmatpush3.msra.mxu0 %v622_v57 }
 0x352   : > { %3574 = vmatmul.mubr.msk.f32.vlgmr.msra.gmra.mxu0 %vm460_vm1, %v620_v58  ;;  %3583 = vmatprep.subr.mxu0 %v826_v59 }
 0x353   : > { %3584 = vmatpush3.msra.mxu0 %v826_v59 }
 0x359   : > { %v3758_v62 = vpop.eup %3757 }
 0x35a   : > { %v822_v1 = vmul.f32 %v3758_v62, %v3750_v45  ;;  %v1140_v45 = vld [vmem:[%s4539_s5 + $0x58] sm:$0xff]  ;;  %v1133_v62 = vld [vmem:[%s4539_s5 + $0x20] sm:$0xff] }
 0x35b   : > { %v3203_v46 = vcombine.low %v1132_v42, %v1140_v45  ;;  %v3204_v47 = vcombine.high %v1132_v42, %v1140_v45  ;;  %v3642_v42 = vld [vmem:[%s4541_s7 + $0xc8] sm:$0xff]   ;;  %v3645_v45 = vld [vmem:[%s4541_s7 + $0x40] sm:$0xff]  }
 0x374   : > { %v815_v60 = vpop.xlane.xlu1 %814 }
 0x375   : > { %3759 = vrcp.f32 %v815_v60  ;;  %v3196_v60 = vld [vmem:[%s4544_s10] ss:$0 sm:$0xff] }
 0x378   : > { %v824_v61 = vpop.permute.xlu1 %823 }
 0x379   : > { %3585 = vmatprep.subr.mxu0 %v824_v61 }
 0x37a   : > { %3586 = vmatpush3.msra.mxu0 %v824_v61 }
 0x37b   : > { %3590 = vmatprep.subr.mxu0 %v506_v5 }
 0x382   : > { %v3760_v63 = vpop.eup %3759 }
 0x383   : > { %v821_v0 = vmul.f32 %v3760_v63, %v3752_v49 }
 0x385   : > { %3587 = vmatprep.mubr.msk.f32.mxu0 %vm460_vm1, %v821_v0 }
 0x386   : > { %3588 = vmatmul.mubr.msk.f32.vlgmr.msra.gmra.mxu0 %vm460_vm1, %v822_v1  ;;  %v1141_v1 = vld [vmem:[%s4539_s5 + $0x60] sm:$0xff] }
 0x387   : > { %3591 = vmatpush3.msra.mxu0 %v506_v5  ;;  %v1142_v5 = vld [vmem:[%s4539_s5 + $0x68] sm:$0xff] }
 0x412   : > { %v3575_v6 = vpop.f32.mrf.mxu0 }
 0x414   : > { %v699_v7 = vpop.f32.mrf.mxu0 }
 0x415   : > { %3597 = vmatprep.mubr.msk.f32.mxu1 %vm513_vm2, %v699_v7  ;;  %v3206_v7 = vcombine.high %v1133_v62, %v1141_v1 }
 0x416   : > { %3598 = vmatmul.mubr.msk.f32.vlgmr.msra.gmra.mxu1 %vm513_vm2, %v3575_v6 }
 0x417   : > { %1370 = vmatpush1.bf16.msra.mxu1 %v3199_v37  ;;  %1387 = vmatprep.mubr.bf16.mxu1 %v3784_v39  ;;  %v3637_v37 = vld [vmem:[%s4541_s7 + $0x50] sm:$0xff]  }
 0x418   : > { %1455 = vmatprep.subr.bf16.mxu1 %v3204_v47  ;;  %v3647_v47 = vld [vmem:[%s4541_s7] sm:$0xff]  }
 0x446   : > { %v3589_v8 = vpop.f32.mrf.mxu0 }
 0x448   : > { %v901_v9 = vpop.f32.mrf.mxu0 }
 0x449   : > { %3592 = vmatprep.mubr.msk.f32.mxu0 %vm513_vm2, %v901_v9  ;;  %v1135_v9 = vld [vmem:[%s4539_s5 + $0x30] sm:$0xff] }
 0x44a   : > { %3593 = vmatmul.mubr.msk.f32.vlgmr.msra.gmra.mxu0 %vm513_vm2, %v3589_v8  ;;  %v3208_v8 = vcombine.high %v1134_v4, %v1142_v5 }
 0x44b   : > { %1344 = vmatprep.mubr.bf16.mxu0 %v3784_v39 }
 0x4d6   : > { %v3599_v10 = vpop.f32.mrf.mxu1 }
 0x4d8   : > { %v1063_v14 = vpop.f32.mrf.mxu1 }
 0x50a   : > { %v3594_v11 = vpop.f32.mrf.mxu0 }
 0x50b   : > { %v1069_v13 = vadd.f32 %v3599_v10, %v3594_v11  ;;  %v1143_v10 = vld [vmem:[%s4539_s5 + $0x70] sm:$0xff]  ;;  %v1136_v11 = vld [vmem:[%s4539_s5 + $0x38] sm:$0xff] }
 0x50c   : > { %v982_v15 = vpop.f32.mrf.mxu0 }
 0x50d   : > { %v1080_v16 = vadd.f32 %v3194_v12, %v1069_v13  ;;  %v1064_v17 = vadd.f32 %v1063_v14, %v982_v15  ;;  %v3205_v13 = vcombine.low %v1133_v62, %v1141_v1  ;;  %v3207_v14 = vcombine.low %v1134_v4, %v1142_v5 }
 0x50e   : > { %v3210_v15 = vcombine.high %v1135_v9, %v1143_v10 }
 0x50f   : > { %v1079_v18 = vadd.f32 %v3194_v12, %v1064_v17  ;;  %v1082_v19 = vadd.f32 %v1080_v16, %v3876_v3  ;;  %v1144_v12 = vld [vmem:[%s4539_s5 + $0x78] sm:$0xff]  ;;  %v3209_v17 = vcombine.low %v1135_v9, %v1143_v10 }
 0x510   : > { %v3212_v16 = vcombine.high %v1136_v11, %v1144_v12 }
 0x511   : > { %v1088_v20 = vsel %vm460_vm1, %v1082_v19, 0.0  ;;  %v1081_v21 = vadd.f32 %v1079_v18, %v3874_v2  ;;  %v1129_v2 = vld [vmem:[%s4539_s5] sm:$0xff]  ;;  %v3211_v18 = vcombine.low %v1136_v11, %v1144_v12 }
 0x512   : > { %1089 = vadd.xlane.f32.xlu1 %v1088_v20  ;;  %v3198_v34 = vcombine.high %v1129_v2, %v1137_v32  ;;  %v3197_v36 = vcombine.low %v1129_v2, %v1137_v32  ;;  %v3618_v20 = vld [vmem:[%s4541_s7 + $0xf8] sm:$0xff]   ;;  %v3631_v2 = vld [vmem:[%s4541_s7 + $0x20] sm:$0xff]  }
 0x513   : > { %v1085_v22 = vsel %vm460_vm1, %v1081_v21, 0.0  ;;  %v3632_v32 = vld [vmem:[%s4541_s7 + $0xa0] sm:$0xff]  }
 0x514   : > { %1086 = vadd.xlane.f32.xlu0 %v1085_v22  ;;  %1326 = vmatprep.subr.bf16.mxu0 %v3198_v34  ;;  %v3620_v22 = vld [vmem:[%s4541_s7 + $0xb8] sm:$0xff]  }
 0x515   : > { %1327 = vmatpush1.bf16.msra.mxu0 %v3197_v36  ;;  %v3634_v34 = vld [vmem:[%s4541_s7 + $0xd8] sm:$0xff]  }
 0x516   : > { %1412 = vmatprep.subr.bf16.mxu0 %v3202_v44  ;;  %v3636_v36 = vld [vmem:[%s4541_s7 + $0x98] sm:$0xff]   ;;  %v3644_v44 = vld [vmem:[%s4541_s7 + $0x88] sm:$0xff]  }
 0x59b   : > { %v1090_v23 = vpop.xlane.xlu1 %1089 }
 0x59c   : > { %v1093_v24 = vmul.f32 0.0625, %v1090_v23  ;;  %v3621_v23 = vld [vmem:[%s4541_s7 + $0x70] sm:$0xff]  }
 0x59d   : > { %v1087_v25 = vpop.xlane.xlu0 %1086 }
 0x59e   : > { %v1092_v26 = vmul.f32 0.0625, %v1087_v25  ;;  %v1095_v27 = vsub.f32 %v1082_v19, %v1093_v24  ;;  %v3617_v19 = vld [vmem:[%s4541_s7 + $0x78] sm:$0xff]   ;;  %v3622_v24 = vld [vmem:[%s4541_s7 + $0xf0] sm:$0xff]  }
 0x59f   : > { %v3623_v25 = vld [vmem:[%s4541_s7 + $0x30] sm:$0xff]  }
 0x5a0   : > { %v1094_v28 = vsub.f32 %v1081_v21, %v1092_v26  ;;  %v1097_v31 = vmul.f32 %v1095_v27, %v1095_v27  ;;  %v3619_v21 = vld [vmem:[%s4541_s7 + $0x38] sm:$0xff]   ;;  %v3624_v26 = vld [vmem:[%s4541_s7 + $0xb0] sm:$0xff]  }
 0x5a2   : > { %v1096_v29 = vmul.f32 %v1094_v28, %v1094_v28  ;;  %v1101_v3 = vsel %vm460_vm1, %v1097_v31, 0.0  ;;  %v3629_v31 = vld [vmem:[%s4541_s7 + $0x60] sm:$0xff]  }
 0x5a4   : > { %v1098_v30 = vsel %vm460_vm1, %v1096_v29, 0.0  ;;  %v3627_v29 = vld [vmem:[%s4541_s7 + $0x28] sm:$0xff]  }
 0x5a5   : > { %1099 = vadd.xlane.f32.xlu0 %v1098_v30  ;;  %v3628_v30 = vld [vmem:[%s4541_s7 + $0xa8] sm:$0xff]  }
 0x5a9   : > { %1102 = vadd.xlane.f32.xlu0 %v1101_v3  ;;  %v3630_v3 = vld [vmem:[%s4541_s7 + $0xe0] sm:$0xff]  }
 0x62e   : > { %v1100_v48 = vpop.xlane.xlu0 %1099 }
 0x62f   : > { %v1104_v49 = vmul.f32 0.0625, %v1100_v48  ;;  %v3648_v48 = vld [vmem:[%s4541_s7 + $0x80] sm:$0xff]  }
 0x631   : > { %v1106_v50 = vadd.f32 1e-05, %v1104_v49  ;;  %v3649_v49 = vld [vmem:[%s4541_s7 + $0x178] sm:$0xff]  }
 0x632   : > { %v1103_v51 = vpop.xlane.xlu0 %1102 }
 0x633   : > { %3761 = vrsqrt.f32 %v1106_v50  ;;  %v1105_v52 = vmul.f32 0.0625, %v1103_v51  ;;  %v3650_v50 = vld [vmem:[%s4541_s7 + $0x1f8] sm:$0xff]   ;;  %v1149_v51 = vlaneseq }
 0x635   : > { %v1107_v53 = vadd.f32 1e-05, %v1105_v52  ;;  %v4123_v52 = vshrl.u32 %v1149_v51, 7 }
 0x637   : > { %3763 = vrsqrt.f32 %v1107_v53  ;;  %v1155_v53 = vsub.s32 1, %v4123_v52  ;;  %v1179_v9 = vsub.s32 7, %v4123_v52 }
 0x640   : > { %v3762_v54 = vpop.eup %3761 }
 0x641   : > { %v1110_v55 = vmul.f32 %v3762_v54, %v1094_v28  ;;  %v3626_v28 = vld [vmem:[%s4541_s7 + $0xe8] sm:$0xff]   ;;  %v1163_v54 = vsub.s32 3, %v4123_v52 }
 0x643   : > { %v1118_v58 = vmul.f32 %v3195_v56, %v1110_v55  ;;  %v1151_v55 = vsub.s32 0, %v4123_v52 }
 0x644   : > { %v3764_v57 = vpop.eup %3763 }
 0x645   : > { %v1111_v59 = vmul.f32 %v3764_v57, %v1095_v27  ;;  %v3980_v63 = vadd.f32 %v3196_v60, %v1118_v58  ;;  %v3625_v27 = vld [vmem:[%s4541_s7 + $0x68] sm:$0xff]   ;;  %v4132_v57 = vld [vmem:[%s4540_s6] sm:$0xff] }
 0x646   : > { %v1152_v62 = vrot.slane %v4132_v57, %v1151_v55 }
 0x647   : > { %v1119_v61 = vmul.f32 %v3195_v56, %v1111_v59  ;;  %v1159_v56 = vsub.s32 2, %v4123_v52 }
 0x649   : > { %v3982_v0 = vadd.f32 %v3196_v60, %v1119_v61  ;;  %v1156_v60 = vrot.slane %v4132_v57, %v1155_v53  ;;  %v1164_v61 = vrot.slane %v4132_v57, %v1163_v54  ;;  %v1160_v1 = vrot.slane %v4132_v57, %v1159_v56 }
 0x64b   : > { %v1128_v6 = vpack.c.bf16 %v3982_v0, %v3980_v63 }
 0x64d   : > { %3213 = vmatmul.mubr.msk.bf16.vlgmr.msra.gmra.mxu0 %vm460_vm1, %v1128_v6  ;;  %3214 = vmatmul.mubr.msk.bf16.vlgmr.msra.gmra.mxu1 %vm460_vm1, %v1128_v6 }
 0x64e   : > { %1413 = vmatpush1.bf16.msra.mxu0 %v3201_v43  ;;  %1456 = vmatpush1.bf16.msra.mxu1 %v3203_v46  ;;  %v3643_v43 = vld [vmem:[%s4541_s7 + $0x8] sm:$0xff]   ;;  %v3646_v46 = vld [vmem:[%s4541_s7 + $0xc0] sm:$0xff]  }
 0x64f   : > { %1430 = vmatprep.mubr.bf16.mxu0 %v3784_v39  ;;  %1473 = vmatprep.mubr.bf16.mxu1 %v3784_v39 }
 0x650   : > { %1498 = vmatprep.subr.bf16.mxu0 %v3206_v7  ;;  %1541 = vmatprep.subr.bf16.mxu1 %v3208_v8  ;;  %v1171_v8 = vsub.s32 5, %v4123_v52 }
 0x655   : > { %3215 = vmatmul.mubr.msk.bf16.vlgmr.msra.gmra.mxu0 %vm460_vm1, %v1128_v6  ;;  %3216 = vmatmul.mubr.msk.bf16.vlgmr.msra.gmra.mxu1 %vm460_vm1, %v1128_v6 }
 0x656   : > { %1499 = vmatpush1.bf16.msra.mxu0 %v3205_v13  ;;  %1542 = vmatpush1.bf16.msra.mxu1 %v3207_v14 }
 0x657   : > { %1516 = vmatprep.mubr.bf16.mxu0 %v3784_v39  ;;  %1559 = vmatprep.mubr.bf16.mxu1 %v3784_v39 }
 0x658   : > { %1584 = vmatprep.subr.bf16.mxu0 %v3210_v15  ;;  %1627 = vmatprep.subr.bf16.mxu1 %v3212_v16 }
 0x65d   : > { %3217 = vmatmul.mubr.msk.bf16.vlgmr.msra.gmra.mxu0 %vm460_vm1, %v1128_v6  ;;  %3218 = vmatmul.mubr.msk.bf16.vlgmr.msra.gmra.mxu1 %vm460_vm1, %v1128_v6 }
 0x65e   : > { %1585 = vmatpush1.bf16.msra.mxu0 %v3209_v17  ;;  %1628 = vmatpush1.bf16.msra.mxu1 %v3211_v18 }
 0x65f   : > { %1602 = vmatprep.mubr.bf16.mxu0 %v3784_v39  ;;  %1645 = vmatprep.mubr.bf16.mxu1 %v3784_v39  ;;  %v3639_v39 = vld [vmem:[%s4541_s7 + $0x10] sm:$0xff]  }
 0x660   : > { %3380 = vmatprep.subr.bf16.mxu0 %v3617_v19  ;;  %3402 = vmatprep.subr.bf16.mxu1 %v3618_v20 }
 0x665   : > { %3219 = vmatmul.mubr.msk.bf16.vlgmr.msra.gmra.mxu0 %vm460_vm1, %v1128_v6  ;;  %3220 = vmatmul.mubr.msk.bf16.vlgmr.msra.gmra.mxu1 %vm460_vm1, %v1128_v6 }
 0x666   : > { %3381 = vmatpush3.bf16.msra.mxu0 %v3619_v21  ;;  %3403 = vmatpush3.bf16.msra.mxu1 %v3620_v22 }
 0x667   : > { %3382 = vmatprep.subr.bf16.mxu0 %v3621_v23  ;;  %3404 = vmatprep.subr.bf16.mxu1 %v3622_v24  ;;  %v1172_v24 = vrot.slane %v4132_v57, %v1171_v8 }
 0x66a   : > { %3383 = vmatpush3.bf16.msra.mxu0 %v3623_v25  ;;  %3405 = vmatpush3.bf16.msra.mxu1 %v3624_v26  ;;  %v1180_v25 = vrot.slane %v4132_v57, %v1179_v9 }
 0x66b   : > { %3384 = vmatprep.subr.bf16.mxu0 %v3625_v27  ;;  %3406 = vmatprep.subr.bf16.mxu1 %v3626_v28 }
 0x66e   : > { %3385 = vmatpush3.bf16.msra.mxu0 %v3627_v29  ;;  %3407 = vmatpush3.bf16.msra.mxu1 %v3628_v30 }
 0x66f   : > { %3386 = vmatprep.subr.bf16.mxu0 %v3629_v31  ;;  %3408 = vmatprep.subr.bf16.mxu1 %v3630_v3 }
 0x672   : > { %3387 = vmatpush3.bf16.msra.mxu0 %v3631_v2  ;;  %3409 = vmatpush3.bf16.msra.mxu1 %v3632_v32 }
 0x673   : > { %3388 = vmatprep.subr.bf16.mxu0 %v3633_v33  ;;  %3410 = vmatprep.subr.bf16.mxu1 %v3634_v34  ;;  %v3651_v34 = vld [vmem:[%s4541_s7 + $0x138] sm:$0xff]  }
 0x676   : > { %3389 = vmatpush3.bf16.msra.mxu0 %v3635_v35  ;;  %3411 = vmatpush3.bf16.msra.mxu1 %v3636_v36  ;;  %v3652_v35 = vld [vmem:[%s4541_s7 + $0x1b8] sm:$0xff]  }
 0x677   : > { %3390 = vmatprep.subr.bf16.mxu0 %v3637_v37  ;;  %3412 = vmatprep.subr.bf16.mxu1 %v3638_v38 }
 0x67a   : > { %3391 = vmatpush3.bf16.msra.mxu0 %v3639_v39  ;;  %3413 = vmatpush3.bf16.msra.mxu1 %v3640_v40  ;;  %v3653_v40 = vld [vmem:[%s4541_s7 + $0x170] sm:$0xff]  }
 0x67b   : > { %3392 = vmatprep.subr.bf16.mxu0 %v3641_v41  ;;  %3414 = vmatprep.subr.bf16.mxu1 %v3642_v42  ;;  %v3654_v41 = vld [vmem:[%s4541_s7 + $0x1f0] sm:$0xff]  }
 0x67e   : > { %3393 = vmatpush3.bf16.msra.mxu0 %v3643_v43  ;;  %3415 = vmatpush3.bf16.msra.mxu1 %v3644_v44 }
 0x67f   : > { %3394 = vmatprep.subr.bf16.mxu0 %v3645_v45  ;;  %3416 = vmatprep.subr.bf16.mxu1 %v3646_v46 }
 0x682   : > { %3395 = vmatpush3.bf16.msra.mxu0 %v3647_v47  ;;  %3417 = vmatpush3.bf16.msra.mxu1 %v3648_v48  ;;  %v3655_v48 = vld [vmem:[%s4541_s7 + $0x130] sm:$0xff]  }
 0x683   : > { %3424 = vmatprep.subr.bf16.mxu0 %v3649_v49  ;;  %3446 = vmatprep.subr.bf16.mxu1 %v3650_v50  ;;  %v3656_v49 = vld [vmem:[%s4541_s7 + $0x1b0] sm:$0xff]   ;;  %v3657_v50 = vld [vmem:[%s4541_s7 + $0x168] sm:$0xff]  }
 0x70d   : > { %v1346_v58 = vpop.f32.mrf.mxu0  ;;  %v1389_v59 = vpop.f32.mrf.mxu1 }
 0x70e   : > { %v1347_v14 = vadd.f32 %v1346_v58, %v1152_v62  ;;  %v1390_v15 = vadd.f32 %v1389_v59, %v1160_v1 }
 0x70f   : > { %v1348_v4 = vpop.f32.mrf.mxu0  ;;  %v1391_v5 = vpop.f32.mrf.mxu1 }
 0x710   : > { %v1349_v10 = vadd.f32 %v1348_v4, %v1156_v60  ;;  %v1392_v11 = vadd.f32 %v1391_v5, %v1164_v61  ;;  %v1656_v30 = vmax.f32 %v1347_v14, 0.0  ;;  %v1658_v31 = vmax.f32 %v1390_v15, 0.0  ;;  %v3659_v4 = vld [vmem:[%s4541_s7 + $0x128] sm:$0xff]   ;;  %v3665_v14 = vld [vmem:[%s4541_s7 + $0x158] sm:$0xff]  }
 0x711   : > { %v1350_v6 = vpop.f32.mrf.mxu0  ;;  %v1393_v7 = vpop.f32.mrf.mxu1  ;;  %v3660_v5 = vld [vmem:[%s4541_s7 + $0x1a8] sm:$0xff]   ;;  %v3666_v15 = vld [vmem:[%s4541_s7 + $0x1d8] sm:$0xff]  }
 0x712   : > { %v1351_v12 = vadd.f32 %v1350_v6, %v1152_v62  ;;  %v1394_v13 = vadd.f32 %v1393_v7, %v1160_v1  ;;  %v1657_v26 = vmax.f32 %v1349_v10, 0.0  ;;  %v1659_v27 = vmax.f32 %v1392_v11, 0.0  ;;  %v3661_v6 = vld [vmem:[%s4541_s7 + $0x160] sm:$0xff]  }
 0x713   : > { %v1352_v16 = vpop.f32.mrf.mxu0  ;;  %v1395_v17 = vpop.f32.mrf.mxu1  ;;  %v3662_v7 = vld [vmem:[%s4541_s7 + $0x1e0] sm:$0xff]  }
 0x714   : > { %v1353_v18 = vadd.f32 %v1352_v16, %v1156_v60  ;;  %v1396_v19 = vadd.f32 %v1395_v17, %v1164_v61  ;;  %v1672_v20 = vmax.f32 %v1351_v12, 0.0  ;;  %v1674_v21 = vmax.f32 %v1394_v13, 0.0  ;;  %v3658_v61 = vld [vmem:[%s4541_s7 + $0x1e8] sm:$0xff]   ;;  %v3663_v11 = vld [vmem:[%s4541_s7 + $0x120] sm:$0xff]   ;;  %v3667_v17 = vld [vmem:[%s4541_s7 + $0x118] sm:$0xff]  }
 0x715   : > { %v4148_v22 = vpop.f32.mrf.mxu0  ;;  %v4150_v23 = vpop.f32.mrf.mxu1  ;;  %v3664_v13 = vld [vmem:[%s4541_s7 + $0x1a0] sm:$0xff]  }
 0x716   : > { %v1673_v28 = vmax.f32 %v1353_v18, 0.0  ;;  %v1675_v29 = vmax.f32 %v1396_v19, 0.0  ;;  %v1688_v36 = vpack.c.bf16 %v1672_v20, %v1656_v30  ;;  %v1690_v37 = vpack.c.bf16 %v1674_v21, %v1658_v31  ;;  %v3668_v19 = vld [vmem:[%s4541_s7 + $0x198] sm:$0xff]   ;;  %v3669_v20 = vld [vmem:[%s4541_s7 + $0x150] sm:$0xff]   ;;  %v3673_v30 = vld [vmem:[%s4541_s7 + $0x148] sm:$0xff]  }
 0x717   : > { %v1434_v3 = vpop.f32.mrf.mxu0  ;;  %v1477_v2 = vpop.f32.mrf.mxu1  ;;  %v3670_v21 = vld [vmem:[%s4541_s7 + $0x1d0] sm:$0xff]   ;;  %v3674_v31 = vld [vmem:[%s4541_s7 + $0x1c8] sm:$0xff]  }
 0x718   : > { %v1689_v32 = vpack.c.bf16 %v1673_v28, %v1657_v26  ;;  %v1691_v33 = vpack.c.bf16 %v1675_v29, %v1659_v27  ;;  %v1435_v42 = vadd.f32 %v1434_v3, %v1172_v24  ;;  %v1478_v43 = vadd.f32 %v1477_v2, %v1180_v25  ;;  %v3671_v27 = vld [vmem:[%s4541_s7 + $0x110] sm:$0xff]  }
 0x719   : > { %v4164_v38 = vpop.f32.mrf.mxu0  ;;  %v4166_v39 = vpop.f32.mrf.mxu1  ;;  %v3672_v29 = vld [vmem:[%s4541_s7 + $0x190] sm:$0xff]  }
 0x71a   : > { %2767 = vmatprep.mubr.bf16.mxu0 %v1689_v32  ;;  %2808 = vmatprep.mubr.bf16.mxu1 %v1691_v33  ;;  %v1661_v51 = vmax.f32 %v1435_v42, 0.0  ;;  %v1663_v58 = vmax.f32 %v1478_v43, 0.0  ;;  %v4253_v32 = vld [vmem:[%s4540_s6 + $0x8] sm:$0xff] }
 0x71b   : > { %v1438_v44 = vpop.f32.mrf.mxu0  ;;  %v1481_v45 = vpop.f32.mrf.mxu1  ;;  %2768 = vmatmul.mubr.bf16.vlgmr.msra.gmra.mxu0 %v1688_v36  ;;  %2809 = vmatmul.mubr.bf16.vlgmr.msra.gmra.mxu1 %v1690_v37  ;;  %v1188_v36 = vrot.slane %v4253_v32, %v1155_v53  ;;  %v3678_v53 = vld [vmem:[%s4541_s7 + $0x1c0] sm:$0xff]  }
 0x71c   : > { %v1439_v46 = vadd.f32 %v1438_v44, %v1172_v24  ;;  %v1482_v47 = vadd.f32 %v1481_v45, %v1180_v25  ;;  %3425 = vmatpush3.bf16.msra.mxu0 %v3651_v34  ;;  %3447 = vmatpush3.bf16.msra.mxu1 %v3652_v35  ;;  %v1167_v24 = vsub.s32 4, %v4123_v52  ;;  %v1175_v25 = vsub.s32 6, %v4123_v52  ;;  %v3675_v34 = vld [vmem:[%s4541_s7 + $0x108] sm:$0xff]  }
 0x71d   : > { %3426 = vmatprep.subr.bf16.mxu0 %v3653_v40  ;;  %3448 = vmatprep.subr.bf16.mxu1 %v3654_v41  ;;  %v4198_v10 = vpop.f32.mrf.mxu0  ;;  %v4203_v12 = vpop.f32.mrf.mxu1  ;;  %v3677_v40 = vld [vmem:[%s4541_s7 + $0x140] sm:$0xff]  }
 0x71e   : > { %v1677_v59 = vmax.f32 %v1439_v46, 0.0  ;;  %v1679_v60 = vmax.f32 %v1482_v47, 0.0  ;;  %v1168_v3 = vrot.slane %v4132_v57, %v1167_v24  ;;  %v1176_v2 = vrot.slane %v4132_v57, %v1175_v25  ;;  %v3676_v57 = vld [vmem:[%s4541_s7 + $0x188] sm:$0xff]  }
 0x71f   : > { %v1520_v16 = vpop.f32.mrf.mxu0  ;;  %v1563_v18 = vpop.f32.mrf.mxu1 }
 0x720   : > { %v1693_v62 = vpack.c.bf16 %v1677_v59, %v1661_v51  ;;  %v1695_v1 = vpack.c.bf16 %v1679_v60, %v1663_v58  ;;  %3427 = vmatpush3.bf16.msra.mxu0 %v3655_v48  ;;  %3449 = vmatpush3.bf16.msra.mxu1 %v3656_v49  ;;  %v1437_v35 = vadd.f32 %v4164_v38, %v1168_v3  ;;  %v3682_v49 = vld [vmem:[%s4541_s7 + $0x2f8] sm:$0xff]  }
 0x721   : > { %3428 = vmatprep.subr.bf16.mxu0 %v3657_v50  ;;  %3450 = vmatprep.subr.bf16.mxu1 %v3658_v61  ;;  %v4228_v26 = vpop.f32.mrf.mxu0  ;;  %v4233_v28 = vpop.f32.mrf.mxu1  ;;  %v1480_v41 = vadd.f32 %v4166_v39, %v1176_v2  ;;  %v1196_v38 = vrot.slane %v4253_v32, %v1163_v54  ;;  %v1433_v42 = vadd.f32 %v4148_v22, %v1168_v3  ;;  %v3679_v39 = vld [vmem:[%s4541_s7 + $0x100] sm:$0xff]   ;;  %v3681_v22 = vld [vmem:[%s4541_s7 + $0x278] sm:$0xff]  }
 0x722   : > { %2849 = vmatprep.mubr.bf16.mxu0 %v1693_v62  ;;  %2890 = vmatprep.mubr.bf16.mxu1 %v1695_v1  ;;  %v1476_v44 = vadd.f32 %v4150_v23, %v1176_v2  ;;  %v1676_v46 = vmax.f32 %v1437_v35, 0.0  ;;  %v1521_v47 = vadd.f32 %v1520_v16, %v1188_v36  ;;  %v3680_v54 = vld [vmem:[%s4541_s7 + $0x180] sm:$0xff]   ;;  %v3683_v60 = vld [vmem:[%s4541_s7 + $0x238] sm:$0xff]   ;;  %v3689_v16 = vld [vmem:[%s4541_s7 + $0x268] sm:$0xff]  }
 0x723   : > { %v1524_v33 = vpop.f32.mrf.mxu0  ;;  %v1567_v37 = vpop.f32.mrf.mxu1  ;;  %v1678_v48 = vmax.f32 %v1480_v41, 0.0  ;;  %v1564_v23 = vadd.f32 %v1563_v18, %v1196_v38  ;;  %v1660_v50 = vmax.f32 %v1433_v42, 0.0  ;;  %v3684_v1 = vld [vmem:[%s4541_s7 + $0x2b8] sm:$0xff]   ;;  %v3691_v18 = vld [vmem:[%s4541_s7 + $0x228] sm:$0xff]   ;;  %v3703_v41 = vld [vmem:[%s4541_s7 + $0x210] sm:$0xff]  }
 0x724   : > { %3429 = vmatpush3.bf16.msra.mxu0 %v3659_v4  ;;  %3451 = vmatpush3.bf16.msra.mxu1 %v3660_v5  ;;  %v1525_v43 = vadd.f32 %v1524_v33, %v1188_v36  ;;  %v1568_v45 = vadd.f32 %v1567_v37, %v1196_v38  ;;  %v1662_v58 = vmax.f32 %v1476_v44, 0.0  ;;  %v1665_v62 = vmax.f32 %v1521_v47, 0.0  ;;  %v3697_v3 = vld [vmem:[%s4541_s7 + $0x258] sm:$0xff]   ;;  %v3701_v37 = vld [vmem:[%s4541_s7 + $0x250] sm:$0xff]   ;;  %v3705_v42 = vld [vmem:[%s4541_s7 + $0x248] sm:$0xff]  }
 0x725   : > { %3430 = vmatprep.subr.bf16.mxu0 %v3661_v6  ;;  %3452 = vmatprep.subr.bf16.mxu1 %v3662_v7  ;;  %v1692_v61 = vpack.c.bf16 %v1676_v46, %v1660_v50  ;;  %v1667_v5 = vmax.f32 %v1564_v23, 0.0  ;;  %v3685_v6 = vld [vmem:[%s4541_s7 + $0x270] sm:$0xff]   ;;  %v3698_v2 = vld [vmem:[%s4541_s7 + $0x2d8] sm:$0xff]   ;;  %v1184_v44 = vrot.slane %v4253_v32, %v1151_v55  ;;  %v3707_v46 = vld [vmem:[%s4541_s7 + $0x208] sm:$0xff]  }
 0x726   : > { %v1681_v51 = vmax.f32 %v1525_v43, 0.0  ;;  %v1683_v59 = vmax.f32 %v1568_v45, 0.0  ;;  %v1694_v4 = vpack.c.bf16 %v1678_v48, %v1662_v58  ;;  %v3700_v36 = vld [vmem:[%s4541_s7 + $0x298] sm:$0xff]   ;;  %v3706_v43 = vld [vmem:[%s4541_s7 + $0x2c8] sm:$0xff]   ;;  %v1192_v45 = vrot.slane %v4253_v32, %v1159_v56  ;;  %v3709_v56 = vld [vmem:[%s4541_s7 + $0x240] sm:$0xff]  }
 0x727   : > { %v1523_v47 = vadd.f32 %v4228_v26, %v1184_v44  ;;  %v3708_v55 = vld [vmem:[%s4541_s7 + $0x288] sm:$0xff]   ;;  %v1212_v26 = vrot.slane %v4253_v32, %v1179_v9  ;;  %v1519_v23 = vadd.f32 %v4198_v10, %v1184_v44  ;;  %v3712_v9 = vld [vmem:[%s4541_s7 + $0x280] sm:$0xff]   ;;  %v3713_v10 = vld [vmem:[%s4541_s7 + $0x378] sm:$0xff]  }
 0x728   : > { %3431 = vmatpush3.bf16.msra.mxu0 %v3663_v11  ;;  %3453 = vmatpush3.bf16.msra.mxu1 %v3664_v13  ;;  %v1697_v7 = vpack.c.bf16 %v1681_v51, %v1665_v62  ;;  %v3686_v11 = vld [vmem:[%s4541_s7 + $0x2f0] sm:$0xff]   ;;  %v1699_v13 = vpack.c.bf16 %v1683_v59, %v1667_v5  ;;  %v1566_v48 = vadd.f32 %v4233_v28, %v1192_v45  ;;  %v3711_v28 = vld [vmem:[%s4541_s7 + $0x200] sm:$0xff]  }
 0x729   : > { %3432 = vmatprep.subr.bf16.mxu0 %v3665_v14  ;;  %3454 = vmatprep.subr.bf16.mxu1 %v3666_v15  ;;  %v3687_v14 = vld [vmem:[%s4541_s7 + $0x230] sm:$0xff]   ;;  %v1562_v50 = vadd.f32 %v4203_v12, %v1192_v45  ;;  %v1680_v58 = vmax.f32 %v1523_v47, 0.0  ;;  %v1664_v62 = vmax.f32 %v1519_v23, 0.0  ;;  %v1200_v47 = vrot.slane %v4253_v32, %v1167_v24  ;;  %v3741_v24 = vld [vmem:[%s4541_s7 + $0x340] sm:$0xff]  }
 0x72a   : > { %v3688_v15 = vld [vmem:[%s4541_s7 + $0x2b0] sm:$0xff]  }
 0x72b   : > { %v3735_v44 = vld [vmem:[%s4541_s7 + $0x310] sm:$0xff]  }
 0x72c   : > { %3433 = vmatpush3.bf16.msra.mxu0 %v3667_v17  ;;  %3455 = vmatpush3.bf16.msra.mxu1 %v3668_v19  ;;  %v3690_v17 = vld [vmem:[%s4541_s7 + $0x2e8] sm:$0xff]   ;;  %v3736_v45 = vld [vmem:[%s4541_s7 + $0x390] sm:$0xff]  }
 0x72d   : > { %3434 = vmatprep.subr.bf16.mxu0 %v3669_v20  ;;  %3456 = vmatprep.subr.bf16.mxu1 %v3670_v21  ;;  %v3692_v19 = vld [vmem:[%s4541_s7 + $0x2a8] sm:$0xff]   ;;  %v3693_v20 = vld [vmem:[%s4541_s7 + $0x260] sm:$0xff]  }
 0x72e   : > { %v3694_v21 = vld [vmem:[%s4541_s7 + $0x2e0] sm:$0xff]  }
 0x730   : > { %3435 = vmatpush3.bf16.msra.mxu0 %v3671_v27  ;;  %3457 = vmatpush3.bf16.msra.mxu1 %v3672_v29  ;;  %v4325_v27 = vpop.f32.mrf.mxu0  ;;  %v3695_v29 = vld [vmem:[%s4541_s7 + $0x220] sm:$0xff]  }
 0x731   : > { %3436 = vmatprep.subr.bf16.mxu0 %v3673_v30  ;;  %3458 = vmatprep.subr.bf16.mxu1 %v3674_v31  ;;  %v4330_v30 = vpop.f32.mrf.mxu1  ;;  %v3696_v31 = vld [vmem:[%s4541_s7 + $0x2a0] sm:$0xff]  }
 0x732   : > { %v1606_v33 = vpop.f32.mrf.mxu0 }
 0x733   : > { %v1649_v35 = vpop.f32.mrf.mxu1 }
 0x734   : > { %3437 = vmatpush3.bf16.msra.mxu0 %v3675_v34  ;;  %3459 = vmatpush3.bf16.msra.mxu1 %v3676_v57  ;;  %v3699_v34 = vld [vmem:[%s4541_s7 + $0x218] sm:$0xff]   ;;  %v3702_v57 = vld [vmem:[%s4541_s7 + $0x2d0] sm:$0xff]   ;;  %v1650_v12 = vadd.f32 %v1649_v35, %v1212_v26  ;;  %v3727_v35 = vld [vmem:[%s4541_s7 + $0x320] sm:$0xff]  }
 0x735   : > { %3438 = vmatprep.subr.bf16.mxu0 %v3677_v40  ;;  %3460 = vmatprep.subr.bf16.mxu1 %v3678_v53  ;;  %v4353_v40 = vpop.f32.mrf.mxu0  ;;  %v4358_v38 = vpop.f32.mrf.mxu1  ;;  %v3704_v53 = vld [vmem:[%s4541_s7 + $0x290] sm:$0xff]  }
 0x738   : > { %3439 = vmatpush3.bf16.msra.mxu0 %v3679_v39  ;;  %3461 = vmatpush3.bf16.msra.mxu1 %v3680_v54  ;;  %v1610_v39 = vpop.f32.mrf.mxu0  ;;  %v1204_v54 = vrot.slane %v4253_v32, %v1171_v8  ;;  %v3710_v8 = vld [vmem:[%s4541_s7 + $0x2c0] sm:$0xff]  }
 0x739   : > { %3468 = vmatprep.subr.bf16.mxu0 %v3681_v22  ;;  %3490 = vmatprep.subr.bf16.mxu1 %v3682_v49  ;;  %v1653_v22 = vpop.f32.mrf.mxu1 }
 0x73a   : > { %v1611_v49 = vadd.f32 %v1610_v39, %v1204_v54  ;;  %v1654_v51 = vadd.f32 %v1653_v22, %v1212_v26  ;;  %v1607_v59 = vadd.f32 %v1606_v33, %v1204_v54  ;;  %v3725_v33 = vld [vmem:[%s4541_s7 + $0x360] sm:$0xff]   ;;  %v3737_v39 = vld [vmem:[%s4541_s7 + $0x348] sm:$0xff]   ;;  %v1208_v54 = vrot.slane %v4253_v32, %v1175_v25 }
 0x73b   : > { %2850 = vmatmul.mubr.bf16.vlgmr.msra.gmra.mxu0 %v1692_v61  ;;  %2891 = vmatmul.mubr.bf16.vlgmr.msra.gmra.mxu1 %v1694_v4  ;;  %v3714_v61 = vld [vmem:[%s4541_s7 + $0x3f8] sm:$0xff]   ;;  %v1666_v4 = vmax.f32 %v1562_v50, 0.0  ;;  %v3739_v22 = vld [vmem:[%s4541_s7 + $0x308] sm:$0xff]   ;;  %v3742_v25 = vld [vmem:[%s4541_s7 + $0x3c0] sm:$0xff]   ;;  %v1605_v32 = vadd.f32 %v4325_v27, %v1200_v47 }
 0x73c   : > { %3469 = vmatpush3.bf16.msra.mxu0 %v3683_v60  ;;  %2931 = vmatprep.mubr.bf16.mxu0 %v1697_v7  ;;  %v1682_v60 = vmax.f32 %v1566_v48, 0.0  ;;  %v1687_v5 = vmax.f32 %v1654_v51, 0.0  ;;  %v1696_v7 = vpack.c.bf16 %v1680_v58, %v1664_v62  ;;  %v1652_v52 = vadd.f32 %v4358_v38, %v1208_v54  ;;  %v3743_v48 = vld [vmem:[%s4541_s7 + $0x300] sm:$0xff]  }
 0x73d   : > { %3491 = vmatpush3.bf16.msra.mxu1 %v3684_v1  ;;  %2972 = vmatprep.mubr.bf16.mxu1 %v1699_v13  ;;  %v1685_v1 = vmax.f32 %v1611_v49, 0.0  ;;  %v3716_v13 = vld [vmem:[%s4541_s7 + $0x3b8] sm:$0xff]   ;;  %v3744_v38 = vld [vmem:[%s4541_s7 + $0x380] sm:$0xff]   ;;  %v1668_v23 = vmax.f32 %v1605_v32, 0.0 }
 0x73e   : > { %3470 = vmatprep.subr.bf16.mxu0 %v3685_v6  ;;  %3492 = vmatprep.subr.bf16.mxu1 %v3686_v11  ;;  %v3715_v6 = vld [vmem:[%s4541_s7 + $0x338] sm:$0xff]   ;;  %v1669_v11 = vmax.f32 %v1607_v59, 0.0 }
 0x740   : > { %3471 = vmatpush3.bf16.msra.mxu0 %v3687_v14  ;;  %v1698_v14 = vpack.c.bf16 %v1682_v60, %v1666_v4 }
 0x741   : > { %3493 = vmatpush3.bf16.msra.mxu1 %v3688_v15  ;;  %3472 = vmatprep.subr.bf16.mxu0 %v3689_v16  ;;  %v1671_v15 = vmax.f32 %v1650_v12, 0.0  ;;  %v3717_v16 = vld [vmem:[%s4541_s7 + $0x370] sm:$0xff]  }
 0x742   : > { %3494 = vmatprep.subr.bf16.mxu1 %v3690_v17  ;;  %v1701_v17 = vpack.c.bf16 %v1685_v1, %v1669_v11  ;;  %v3221_v11 = vld [vmem:[%s4542_s8] ss:$0 sm:$0xff] }
 0x744   : > { %3473 = vmatpush3.bf16.msra.mxu0 %v3691_v18  ;;  %v3718_v18 = vld [vmem:[%s4541_s7 + $0x3f0] sm:$0xff]  }
 0x745   : > { %3495 = vmatpush3.bf16.msra.mxu1 %v3692_v19  ;;  %3474 = vmatprep.subr.bf16.mxu0 %v3693_v20  ;;  %v1703_v19 = vpack.c.bf16 %v1687_v5, %v1671_v15  ;;  %v3719_v20 = vld [vmem:[%s4541_s7 + $0x330] sm:$0xff]  }
 0x746   : > { %3496 = vmatprep.subr.bf16.mxu1 %v3694_v21  ;;  %v3720_v21 = vld [vmem:[%s4541_s7 + $0x3b0] sm:$0xff]  }
 0x748   : > { %3475 = vmatpush3.bf16.msra.mxu0 %v3695_v29  ;;  %v3721_v29 = vld [vmem:[%s4541_s7 + $0x368] sm:$0xff]  }
 0x749   : > { %3497 = vmatpush3.bf16.msra.mxu1 %v3696_v31  ;;  %3476 = vmatprep.subr.bf16.mxu0 %v3697_v3  ;;  %v3722_v31 = vld [vmem:[%s4541_s7 + $0x3e8] sm:$0xff]  }
 0x74a   : > { %3498 = vmatprep.subr.bf16.mxu1 %v3698_v2  ;;  %v3723_v3 = vld [vmem:[%s4541_s7 + $0x328] sm:$0xff]  }
 0x74b   : > { %v3724_v2 = vld [vmem:[%s4541_s7 + $0x3a8] sm:$0xff]  }
 0x74c   : > { %3477 = vmatpush3.bf16.msra.mxu0 %v3699_v34  ;;  %v3726_v34 = vld [vmem:[%s4541_s7 + $0x3e0] sm:$0xff]  }
 0x74d   : > { %3499 = vmatpush3.bf16.msra.mxu1 %v3700_v36  ;;  %3478 = vmatprep.subr.bf16.mxu0 %v3701_v37  ;;  %v3728_v36 = vld [vmem:[%s4541_s7 + $0x3a0] sm:$0xff]   ;;  %v3729_v37 = vld [vmem:[%s4541_s7 + $0x358] sm:$0xff]  }
 0x74e   : > { %3500 = vmatprep.subr.bf16.mxu1 %v3702_v57  ;;  %v3730_v57 = vld [vmem:[%s4541_s7 + $0x3d8] sm:$0xff]  }
 0x750   : > { %3479 = vmatpush3.bf16.msra.mxu0 %v3703_v41  ;;  %v3731_v41 = vld [vmem:[%s4541_s7 + $0x318] sm:$0xff]  }
 0x751   : > { %3501 = vmatpush3.bf16.msra.mxu1 %v3704_v53  ;;  %3480 = vmatprep.subr.bf16.mxu0 %v3705_v42  ;;  %v3732_v53 = vld [vmem:[%s4541_s7 + $0x398] sm:$0xff]   ;;  %v3733_v42 = vld [vmem:[%s4541_s7 + $0x350] sm:$0xff]  }
 0x752   : > { %3502 = vmatprep.subr.bf16.mxu1 %v3706_v43  ;;  %v3734_v43 = vld [vmem:[%s4541_s7 + $0x3d0] sm:$0xff]  }
 0x754   : > { %3481 = vmatpush3.bf16.msra.mxu0 %v3707_v46  ;;  %v3738_v46 = vld [vmem:[%s4541_s7 + $0x3c8] sm:$0xff]  }
 0x755   : > { %3503 = vmatpush3.bf16.msra.mxu1 %v3708_v55  ;;  %3482 = vmatprep.subr.bf16.mxu0 %v3709_v56  ;;  %v1609_v55 = vadd.f32 %v4353_v40, %v1200_v47  ;;  %v3740_v56 = vld [vmem:[%s4541_s7 + $0x388] sm:$0xff]   ;;  %v1648_v40 = vadd.f32 %v4330_v30, %v1208_v54 }
 0x756   : > { %3504 = vmatprep.subr.bf16.mxu1 %v3710_v8  ;;  %v1686_v8 = vmax.f32 %v1652_v52, 0.0 }
 0x757   : > { %v1684_v26 = vmax.f32 %v1609_v55, 0.0  ;;  %v1670_v49 = vmax.f32 %v1648_v40, 0.0 }
 0x758   : > { %3483 = vmatpush3.bf16.msra.mxu0 %v3711_v28 }
 0x759   : > { %3505 = vmatpush3.bf16.msra.mxu1 %v3712_v9  ;;  %3512 = vmatprep.subr.bf16.mxu0 %v3713_v10  ;;  %v1700_v27 = vpack.c.bf16 %v1684_v26, %v1668_v23  ;;  %v1702_v30 = vpack.c.bf16 %v1686_v8, %v1670_v49 }
 0x75a   : > { %3534 = vmatprep.subr.bf16.mxu1 %v3714_v61 }
 0x75b   : > { %2932 = vmatmul.mubr.bf16.vlgmr.msra.gmra.mxu0 %v1696_v7 }
 0x75c   : > { %2973 = vmatmul.mubr.bf16.vlgmr.msra.gmra.mxu1 %v1698_v14  ;;  %3513 = vmatpush3.bf16.msra.mxu0 %v3715_v6 }
 0x75d   : > { %3013 = vmatprep.mubr.bf16.mxu0 %v1701_v17  ;;  %3535 = vmatpush3.bf16.msra.mxu1 %v3716_v13 }
 0x75e   : > { %3054 = vmatprep.mubr.bf16.mxu1 %v1703_v19  ;;  %3514 = vmatprep.subr.bf16.mxu0 %v3717_v16 }
 0x75f   : > { %3536 = vmatprep.subr.bf16.mxu1 %v3718_v18 }
 0x760   : > { %3515 = vmatpush3.bf16.msra.mxu0 %v3719_v20 }
 0x761   : > { %3537 = vmatpush3.bf16.msra.mxu1 %v3720_v21  ;;  %3516 = vmatprep.subr.bf16.mxu0 %v3721_v29 }
 0x762   : > { %3538 = vmatprep.subr.bf16.mxu1 %v3722_v31 }
 0x764   : > { %3517 = vmatpush3.bf16.msra.mxu0 %v3723_v3 }
 0x765   : > { %3539 = vmatpush3.bf16.msra.mxu1 %v3724_v2  ;;  %3518 = vmatprep.subr.bf16.mxu0 %v3725_v33 }
 0x766   : > { %3540 = vmatprep.subr.bf16.mxu1 %v3726_v34 }
 0x768   : > { %3519 = vmatpush3.bf16.msra.mxu0 %v3727_v35 }
 0x769   : > { %3541 = vmatpush3.bf16.msra.mxu1 %v3728_v36  ;;  %3520 = vmatprep.subr.bf16.mxu0 %v3729_v37 }
 0x76a   : > { %3542 = vmatprep.subr.bf16.mxu1 %v3730_v57 }
 0x76c   : > { %3521 = vmatpush3.bf16.msra.mxu0 %v3731_v41 }
 0x76d   : > { %3543 = vmatpush3.bf16.msra.mxu1 %v3732_v53  ;;  %3522 = vmatprep.subr.bf16.mxu0 %v3733_v42 }
 0x76e   : > { %3544 = vmatprep.subr.bf16.mxu1 %v3734_v43 }
 0x770   : > { %3523 = vmatpush3.bf16.msra.mxu0 %v3735_v44 }
 0x771   : > { %3545 = vmatpush3.bf16.msra.mxu1 %v3736_v45  ;;  %3524 = vmatprep.subr.bf16.mxu0 %v3737_v39 }
 0x772   : > { %3546 = vmatprep.subr.bf16.mxu1 %v3738_v46 }
 0x774   : > { %3525 = vmatpush3.bf16.msra.mxu0 %v3739_v22 }
 0x775   : > { %3547 = vmatpush3.bf16.msra.mxu1 %v3740_v56  ;;  %3526 = vmatprep.subr.bf16.mxu0 %v3741_v24 }
 0x776   : > { %3548 = vmatprep.subr.bf16.mxu1 %v3742_v25 }
 0x778   : > { %3527 = vmatpush3.bf16.msra.mxu0 %v3743_v48 }
 0x779   : > { %3549 = vmatpush3.bf16.msra.mxu1 %v3744_v38 }
 0x77b   : > { %3014 = vmatmul.mubr.bf16.vlgmr.msra.gmra.mxu0 %v1700_v27 }
 0x77c   : > { %3055 = vmatmul.mubr.bf16.vlgmr.msra.gmra.mxu1 %v1702_v30 }
 0x7db   : > { %v3396_v50 = vpop.f32.mrf.mxu0  ;;  %v3418_v51 = vpop.f32.mrf.mxu1 }
 0x7dd   : > { %v3397_v28 = vpop.f32.mrf.mxu0  ;;  %v3419_v58 = vpop.f32.mrf.mxu1 }
 0x7de   : > { %v3398_v7 = vadd.f32 %v3397_v28, %v3396_v50  ;;  %v3420_v19 = vadd.f32 %v3419_v58, %v3418_v51 }
 0x7df   : > { %v3399_v59 = vpop.f32.mrf.mxu0  ;;  %v3421_v9 = vpop.f32.mrf.mxu1 }
 0x7e0   : > { %v2770_v15 = vadd.f32 %v3398_v7, %v3221_v11 }
 0x7e1   : > { %v3400_v10 = vpop.f32.mrf.mxu0  ;;  %v3422_v12 = vpop.f32.mrf.mxu1 }
 0x7e2   : > { %v3401_v16 = vadd.f32 %v3400_v10, %v3399_v59  ;;  %v2811_v21 = vadd.f32 %v3420_v19, %v2770_v15  ;;  %v3423_v2 = vadd.f32 %v3422_v12, %v3421_v9 }
 0x7e4   : > { %v2773_v29 = vadd.f32 %v3401_v16, %v3221_v11 }
 0x7e6   : > { %v2814_v35 = vadd.f32 %v3423_v2, %v2773_v29 }
 0x7fb   : > { %v3440_v60 = vpop.f32.mrf.mxu0  ;;  %v3462_v61 = vpop.f32.mrf.mxu1 }
 0x7fd   : > { %v3441_v62 = vpop.f32.mrf.mxu0  ;;  %v3463_v1 = vpop.f32.mrf.mxu1 }
 0x7fe   : > { %v3442_v20 = vadd.f32 %v3441_v62, %v3440_v60  ;;  %v3464_v36 = vadd.f32 %v3463_v1, %v3462_v61 }
 0x7ff   : > { %v3443_v4 = vpop.f32.mrf.mxu0  ;;  %v3465_v5 = vpop.f32.mrf.mxu1 }
 0x800   : > { %v2852_v33 = vadd.f32 %v3442_v20, %v2811_v21  ;;  %v3351_v20 = vld [vmem:[%s4546_s12] ss:$0 sm:$0xff] }
 0x801   : > { %v3444_v6 = vpop.f32.mrf.mxu0  ;;  %v3466_v14 = vpop.f32.mrf.mxu1 }
 0x802   : > { %v3445_v34 = vadd.f32 %v3444_v6, %v3443_v4  ;;  %v2893_v53 = vadd.f32 %v3464_v36, %v2852_v33  ;;  %v3467_v43 = vadd.f32 %v3466_v14, %v3465_v5 }
 0x804   : > { %v2855_v42 = vadd.f32 %v3445_v34, %v2814_v35 }
 0x806   : > { %v2896_v47 = vadd.f32 %v3467_v43, %v2855_v42 }
 0x81b   : > { %v3484_v13 = vpop.f32.mrf.mxu0 }
 0x81c   : > { %v3506_v17 = vpop.f32.mrf.mxu1 }
 0x81d   : > { %v3485_v18 = vpop.f32.mrf.mxu0 }
 0x81e   : > { %v3507_v31 = vpop.f32.mrf.mxu1  ;;  %v3486_v37 = vadd.f32 %v3485_v18, %v3484_v13  ;;  %v3350_v18 = vld [vmem:[%s4545_s11] ss:$0 sm:$0xff] }
 0x81f   : > { %v3487_v3 = vpop.f32.mrf.mxu0  ;;  %v3508_v54 = vadd.f32 %v3507_v31, %v3506_v17 }
 0x820   : > { %v3509_v57 = vpop.f32.mrf.mxu1  ;;  %v2934_v44 = vadd.f32 %v3486_v37, %v2893_v53 }
 0x821   : > { %v3488_v41 = vpop.f32.mrf.mxu0 }
 0x822   : > { %v3489_v45 = vadd.f32 %v3488_v41, %v3487_v3  ;;  %v3510_v39 = vpop.f32.mrf.mxu1  ;;  %v2975_v56 = vadd.f32 %v3508_v54, %v2934_v44 }
 0x823   : > { %v3511_v40 = vadd.f32 %v3510_v39, %v3509_v57 }
 0x824   : > { %v2937_v24 = vadd.f32 %v3489_v45, %v2896_v47 }
 0x826   : > { %v2978_v23 = vadd.f32 %v3511_v40, %v2937_v24 }
 0x83b   : > { %v3528_v46 = vpop.f32.mrf.mxu0 }
 0x83c   : > { %v3550_v22 = vpop.f32.mrf.mxu1 }
 0x83d   : > { %v3529_v55 = vpop.f32.mrf.mxu0 }
 0x83e   : > { %v3530_v52 = vadd.f32 %v3529_v55, %v3528_v46  ;;  %v3551_v25 = vpop.f32.mrf.mxu1 }
 0x83f   : > { %v3531_v32 = vpop.f32.mrf.mxu0  ;;  %v3552_v26 = vadd.f32 %v3551_v25, %v3550_v22 }
 0x840   : > { %v3016_v48 = vadd.f32 %v3530_v52, %v2975_v56  ;;  %v3553_v38 = vpop.f32.mrf.mxu1 }
 0x841   : > { %v3532_v8 = vpop.f32.mrf.mxu0 }
 0x842   : > { %v3057_v49 = vadd.f32 %v3552_v26, %v3016_v48  ;;  %v3533_v27 = vadd.f32 %v3532_v8, %v3531_v32  ;;  %v3554_v30 = vpop.f32.mrf.mxu1 }
 0x843   : > { %v3555_v51 = vadd.f32 %v3554_v30, %v3553_v38 }
 0x844   : > { %v3019_v50 = vadd.f32 %v3533_v27, %v2978_v23  ;;  %v3063_v28 = vadd.f32 %v3057_v49, %v3980_v63 }
 0x846   : > { %v3060_v58 = vadd.f32 %v3555_v51, %v3019_v50  ;;  %v3067_v59 = vsel %vm460_vm1, %v3063_v28, 0.0 }
 0x847   : > { %3068 = vadd.xlane.f32.xlu1 %v3067_v59 }
 0x848   : > { %v3064_v9 = vadd.f32 %v3060_v58, %v3982_v0 }
 0x84a   : > { %v3070_v10 = vsel %vm460_vm1, %v3064_v9, 0.0 }
 0x84b   : > { %3071 = vadd.xlane.f32.xlu0 %v3070_v10 }
 0x8d0   : > { %v3069_v60 = vpop.xlane.xlu1 %3068 }
 0x8d1   : > { %v3073_v12 = vmul.f32 0.0625, %v3069_v60 }
 0x8d3   : > { %v3075_v61 = vsub.f32 %v3063_v28, %v3073_v12 }
 0x8d4   : > { %v3072_v62 = vpop.xlane.xlu0 %3071 }
 0x8d5   : > { %v3074_v1 = vmul.f32 0.0625, %v3072_v62  ;;  %v3077_v4 = vmul.f32 %v3075_v61, %v3075_v61 }
 0x8d7   : > { %v3076_v5 = vsub.f32 %v3064_v9, %v3074_v1  ;;  %v3079_v6 = vsel %vm460_vm1, %v3077_v4, 0.0 }
 0x8d8   : > { %3080 = vadd.xlane.f32.xlu1 %v3079_v6 }
 0x8d9   : > { %v3078_v63 = vmul.f32 %v3076_v5, %v3076_v5 }
 0x8db   : > { %v3082_v7 = vsel %vm460_vm1, %v3078_v63, 0.0 }
 0x8dc   : > { %3083 = vadd.xlane.f32.xlu0 %v3082_v7 }
 0x961   : > { %v3081_v11 = vpop.xlane.xlu1 %3080 }
 0x962   : > { %v3085_v0 = vmul.f32 0.0625, %v3081_v11 }
 0x964   : > { %v3087_v13 = vadd.f32 1e-05, %v3085_v0 }
 0x965   : > { %v3084_v14 = vpop.xlane.xlu0 %3083 }
 0x966   : > { %3765 = vrsqrt.f32 %v3087_v13  ;;  %v3086_v15 = vmul.f32 0.0625, %v3084_v14 }
 0x968   : > { %v3088_v16 = vadd.f32 1e-05, %v3086_v15 }
 0x96a   : > { %3767 = vrsqrt.f32 %v3088_v16 }
 0x973   : > { %v3766_v17 = vpop.eup %3765 }
 0x974   : > { %v3091_v19 = vmul.f32 %v3766_v17, %v3075_v61 }
 0x976   : > { %v3099_v21 = vmul.f32 %v3350_v18, %v3091_v19 }
 0x977   : > { %v3768_v29 = vpop.eup %3767 }
 0x978   : > { %v3107_v31 = vadd.f32 %v3351_v20, %v3099_v21  ;;  %v3092_v3 = vmul.f32 %v3768_v29, %v3076_v5 }
 0x97a   : > { %3109 = vst.msk [vmem:[%s440_s27] sm:$0xff] %vm460_vm1, %v3107_v31  ;;  %v3100_v2 = vmul.f32 %v3350_v18, %v3092_v3 }
 0x97c   : > { %v3108_v33 = vadd.f32 %v3351_v20, %v3100_v2 }
 0x97e   : > { %3110 = vst.msk [vmem:[%s440_s27 + $0x8] sm:$0xff] %vm460_vm1, %v3108_v33 }
 0x97f PF: > { %s23_s25 = sadd.s32 1, %s3775_s25  }
 0x980   : > { %p20_p4 = scmp.ge.s32.totalorder %s23_s25, 4  }
 0x982   :  { %22 = sbr.rel (!%p20_p4) target bundleno = 1 (0x1), region = 102 }

</bundles_post_ra>
